<compile_context>
chip_gen: v7x
topology: tpu7x:2x2x1
jax: 0.10.0
libtpu: 0.0.40
codegen_flags: <defaults>
</compile_context>

<pallas_src>
import math

import jax
import jax.numpy as jnp
from jax import lax
from jax.experimental import pallas as pl
from jax.experimental.pallas import tpu as pltpu

BN_EPS = 1e-5
INV_SQRT2 = 1.0 / math.sqrt(2.0)


# ----------------------------------------------------------------------------
# Fused ResBranch kernel (one batch element per grid step, all blocks inside).
# ----------------------------------------------------------------------------
def _make_resbranch_kernel(H, W, metas):
    """metas: list of dicts per block with keys 'cout', 'has_skip'."""
    HW = H * W

    def kernel(*refs):
        x_ref = refs[0]
        o_ref = refs[-1]
        wrefs = refs[1:-1]

        # ---- static border masks for the 9 taps (computed once per trace) ----
        pos = lax.broadcasted_iota(jnp.int32, (1, HW), 1)        # flattened h*W+w
        if (W & (W - 1)) == 0:                                   # W power of two
            col = jnp.bitwise_and(pos, W - 1)
        else:
            col = lax.rem(pos, W)

        masks = []
        for k in range(9):
            dy, dx = divmod(k, 3)
            conds = []
            if dy == 0:
                conds.append(pos >= W)                 # source row h-1 >= 0
            if dy == 2:
                conds.append(pos < (H - 1) * W)        # source row h+1 <= H-1
            if dx == 0:
                conds.append(col >= 1)                 # source col w-1 >= 0
            if dx == 2:
                conds.append(col < (W - 1))            # source col w+1 <= W-1
            if conds:
                m = conds[0]
                for c in conds[1:]:
                    m = jnp.logical_and(m, c)
                masks.append(m.astype(jnp.float32))
            else:
                masks.append(None)                     # center tap: always valid

        def conv3x3(a, w_ref):
            # a: (Cin, HW) f32, w_ref: (9, Nout, Cin).  Returns (Nout, HW) f32.
            nout = w_ref.shape[1]
            acc = jnp.zeros((nout, HW), jnp.float32)
            for k in range(9):
                dy, dx = divmod(k, 3)
                off = (dy - 1) * W + (dx - 1)          # flattened source offset
                t = a if off == 0 else pltpu.roll(a, shift=(-off) % HW, axis=1)
                if masks[k] is not None:
                    t = t * masks[k]                   # zero out-of-bounds taps
                acc = acc + jnp.dot(w_ref[k], t,
                                    preferred_element_type=jnp.float32)
            return acc

        x = x_ref[...].astype(jnp.float32)             # (Cin, HW)

        i = 0
        for mt in metas:
            cout = mt["cout"]
            if mt["has_skip"]:
                w1_ref, b1_ref, bs_ref, w2_ref, b2_ref = wrefs[i:i + 5]
                i += 5
            else:
                w1_ref, b1_ref, w2_ref, b2_ref = wrefs[i:i + 4]
                i += 4

            # conv1 (BN1 scale folded) fused with the skip conv (if any): one
            # pass over the 9 taps, one matmul chain with Nout = (2*)Cout.
            y = conv3x3(x, w1_ref)
            if mt["has_skip"]:
                y1 = jnp.maximum(y[:cout] + b1_ref[...], 0.0)
                res = y[cout:] + bs_ref[...]
            else:
                y1 = jnp.maximum(y + b1_ref[...], 0.0)
                res = x                                # exact identity skip

            # conv2 (BN2 scale folded) + bias, residual add, 1/sqrt(2).
            y2 = conv3x3(y1, w2_ref) + b2_ref[...]
            x = (y2 + res) * INV_SQRT2

        o_ref[...] = x.astype(o_ref.dtype)

    return kernel


def resbranch_forward(x_nchw, params):
    B, C, H, W = x_nchw.shape
    HW = H * W
    x = x_nchw.reshape(B, C, HW)                       # free reshape, stays NCHW

    def const_spec(shape):
        return pl.BlockSpec(shape, lambda b, _n=len(shape): (0,) * _n)

    metas = []
    args = [x]
    in_specs = [pl.BlockSpec((None, C, HW), lambda b: (b, 0, 0))]
    for p in params:
        metas.append(dict(cout=p["cout"], has_skip=p["has_skip"]))
        if p["has_skip"]:
            blk = [p["w1cat"], p["b1"], p["bs"], p["w2k"], p["b2"]]
        else:
            blk = [p["w1cat"], p["b1"], p["w2k"], p["b2"]]
        for a in blk:
            args.append(a)
            in_specs.append(const_spec(a.shape))

    Cout = params[-1]["cout"]
    kernel = _make_resbranch_kernel(H, W, metas)

    out = pl.pallas_call(
        kernel,
        out_shape=jax.ShapeDtypeStruct((B, Cout, HW), jnp.float32),
        grid_spec=pltpu.PrefetchScalarGridSpec(
            num_scalar_prefetch=0,
            grid=(B,),
            in_specs=in_specs,
            out_specs=pl.BlockSpec((None, Cout, HW), lambda b: (b, 0, 0)),
        ),
        compiler_params=pltpu.CompilerParams(
            dimension_semantics=("parallel",),
        ),
    )(*args)
    return out.reshape(B, Cout, H, W)


# ----------------------------------------------------------------------------
# Deterministic parameter init (synthetic; mirrors module __init__ shapes).
# BN scale is folded into the conv weights; only a per-channel bias remains.
# ----------------------------------------------------------------------------
def init_resblock_params(key, Cin, Cout):
    has_skip = (Cin != Cout)   # stride is always 1 in ResBranch
    ks = jax.random.split(key, 6)

    def conv_init(k, cout, cin):
        kw, kb = jax.random.split(k)
        bound = 1.0 / math.sqrt(cin * 9)
        w = jax.random.uniform(kw, (cout, cin, 3, 3), jnp.float32, -bound, bound)
        b = jax.random.uniform(kb, (cout,), jnp.float32, -bound, bound)
        return w, b

    def bn_init(k, c):
        k1, k2, k3, k4 = jax.random.split(k, 4)
        gamma = 1.0 + 0.1 * jax.random.normal(k1, (c,), jnp.float32)
        beta = 0.1 * jax.random.normal(k2, (c,), jnp.float32)
        rmean = 0.1 * jax.random.normal(k3, (c,), jnp.float32)
        rvar = 0.5 + jax.random.uniform(k4, (c,), jnp.float32)
        return gamma, beta, rmean, rvar

    w1, cb1 = conv_init(ks[0], Cout, Cin)
    g1, bt1, rm1, rv1 = bn_init(ks[1], Cout)
    w2, cb2 = conv_init(ks[2], Cout, Cout)
    g2, bt2, rm2, rv2 = bn_init(ks[3], Cout)
    if has_skip:
        ws, cbs = conv_init(ks[4], Cout, Cin)
    else:
        ws = jnp.zeros((Cout, Cin, 3, 3), jnp.float32)
        cbs = jnp.zeros((Cout,), jnp.float32)

    def to_taps(w):   # (Cout, Cin, 3, 3) -> (9, Cout, Cin), tap k = dy*3+dx
        return jnp.transpose(w, (2, 3, 0, 1)).reshape(9, w.shape[0], w.shape[1])

    # Fold eval-mode BN scale into the conv weights (scale*conv(x,w) == conv(x,w*scale)).
    s1 = g1 / jnp.sqrt(rv1 + BN_EPS)
    s2 = g2 / jnp.sqrt(rv2 + BN_EPS)
    w1k = to_taps(w1) * s1[None, :, None]                      # (9, Cout, Cin)
    b1 = ((cb1 - rm1) * s1 + bt1)[:, None]                     # (Cout, 1)
    w2k = to_taps(w2) * s2[None, :, None]                      # (9, Cout, Cout)
    b2 = ((cb2 - rm2) * s2 + bt2)[:, None]                     # (Cout, 1)

    if has_skip:
        w1cat = jnp.concatenate([w1k, to_taps(ws)], axis=1)    # (9, 2*Cout, Cin)
        bs = cbs[:, None]                                      # (Cout, 1)
    else:
        w1cat = w1k
        bs = None

    return dict(
        cin=Cin, cout=Cout, has_skip=has_skip,
        # kernel-layout (folded) params
        w1cat=w1cat, b1=b1, bs=bs, w2k=w2k, b2=b2,
        # raw params for the pure-JAX reference
        w1=w1, cb1=cb1, g1=g1, bt1=bt1, rm1=rm1, rv1=rv1,
        w2=w2, cb2=cb2, g2=g2, bt2=bt2, rm2=rm2, rv2=rv2,
        ws=ws, cbs=cbs,
    )


def init_resbranch_params(key, in_channels, out_channels, num_blocks):
    keys = jax.random.split(key, num_blocks)
    # NB: like the PyTorch module, every block is ResBlock(in_channels, out_channels);
    # num_blocks > 1 therefore requires in_channels == out_channels.
    return [init_resblock_params(k, in_channels, out_channels) for k in keys]


# ----------------------------------------------------------------------------
# Pure-JAX reference (eval-mode BN) for correctness checking.
# ----------------------------------------------------------------------------
def _conv3x3_ref(x_nhwc, w_oihw, b):
    w = jnp.transpose(w_oihw, (2, 3, 1, 0))   # -> HWIO
    y = lax.conv_general_dilated(
        x_nhwc, w, (1, 1), ((1, 1), (1, 1)),
        dimension_numbers=("NHWC", "HWIO", "NHWC"))
    return y + b


def _bn_ref(x, gamma, beta, rmean, rvar):
    return (x - rmean) / jnp.sqrt(rvar + BN_EPS) * gamma + beta


def resbranch_ref(x_nchw, params):
    x = jnp.transpose(x_nchw, (0, 2, 3, 1))
    for p in params:
        res = _conv3x3_ref(x, p["ws"], p["cbs"]) if p["has_skip"] else x
        y = _conv3x3_ref(x, p["w1"], p["cb1"])
        y = jnp.maximum(_bn_ref(y, p["g1"], p["bt1"], p["rm1"], p["rv1"]), 0.0)
        y = _conv3x3_ref(y, p["w2"], p["cb2"])
        y = _bn_ref(y, p["g2"], p["bt2"], p["rm2"], p["rv2"])
        x = (y + res) * INV_SQRT2
    return jnp.transpose(x, (0, 3, 1, 2))


if __name__ == "__main__":
    key = jax.random.PRNGKey(0)
    kx, kp1, kp2 = jax.random.split(key, 3)

    B, C, H, W = 2, 4, 16, 16            # NCHW input, matching PyTorch convention
    x = jax.random.normal(kx, (B, C, H, W), jnp.float32)

    # Case 1: ResBranch(4, 4, num_blocks=2) -> identity skip path.
    params1 = init_resbranch_params(kp1, C, C, 2)
    out1 = jax.block_until_ready(resbranch_forward(x, params1))
    ref1 = jax.block_until_ready(resbranch_ref(x, params1))
    assert out1.shape == (B, C, H, W), out1.shape
    if not jnp.allclose(out1, ref1, rtol=1e-4, atol=1e-4):
        raise AssertionError("Pallas kernel mismatch vs reference (identity-skip case)")

    # Case 2: ResBranch(4, 8, num_blocks=1) -> conv skip path (Cin != Cout).
    params2 = init_resbranch_params(kp2, C, 8, 1)
    out2 = jax.block_until_ready(resbranch_forward(x, params2))
    ref2 = jax.block_until_ready(resbranch_ref(x, params2))
    assert out2.shape == (B, 8, H, W), out2.shape
    if not jnp.allclose(out2, ref2, rtol=1e-4, atol=1e-4):
        raise AssertionError("Pallas kernel mismatch vs reference (conv-skip case)")

    print("KERNEL_OK")
</pallas_src>

<mosaic_0001>
module attributes {stable_mosaic.version = 11 : i64} {
  func.func @kernel(%arg0: i32, %arg1: memref<1x4x256xf32, #tpu.memory_space<vmem>>, %arg2: memref<9x4x4xf32, #tpu.memory_space<vmem>>, %arg3: memref<4x1xf32, #tpu.memory_space<vmem>>, %arg4: memref<9x4x4xf32, #tpu.memory_space<vmem>>, %arg5: memref<4x1xf32, #tpu.memory_space<vmem>>, %arg6: memref<9x4x4xf32, #tpu.memory_space<vmem>>, %arg7: memref<4x1xf32, #tpu.memory_space<vmem>>, %arg8: memref<9x4x4xf32, #tpu.memory_space<vmem>>, %arg9: memref<4x1xf32, #tpu.memory_space<vmem>>, %arg10: memref<1x4x256xf32, #tpu.memory_space<vmem>>) attributes {dimension_semantics = [#tpu.dimension_semantics<parallel>], iteration_bounds = array<i64: 2>, scalar_prefetch = 0 : i64, scratch_operands = 0 : i64, tpu.core_type = #tpu.core_type<tc>, window_params = [{transform_indices = @transform_0, window_bounds = array<i64: 1, 4, 256>}, {pipeline_mode = #tpu.pipeline_mode<synchronous>, transform_indices = @transform_1, window_bounds = array<i64: 9, 4, 4>}, {pipeline_mode = #tpu.pipeline_mode<synchronous>, transform_indices = @transform_2, window_bounds = array<i64: 4, 1>}, {pipeline_mode = #tpu.pipeline_mode<synchronous>, transform_indices = @transform_3, window_bounds = array<i64: 9, 4, 4>}, {pipeline_mode = #tpu.pipeline_mode<synchronous>, transform_indices = @transform_4, window_bounds = array<i64: 4, 1>}, {pipeline_mode = #tpu.pipeline_mode<synchronous>, transform_indices = @transform_5, window_bounds = array<i64: 9, 4, 4>}, {pipeline_mode = #tpu.pipeline_mode<synchronous>, transform_indices = @transform_6, window_bounds = array<i64: 4, 1>}, {pipeline_mode = #tpu.pipeline_mode<synchronous>, transform_indices = @transform_7, window_bounds = array<i64: 9, 4, 4>}, {pipeline_mode = #tpu.pipeline_mode<synchronous>, transform_indices = @transform_8, window_bounds = array<i64: 4, 1>}, {transform_indices = @transform_9, window_bounds = array<i64: 1, 4, 256>}]} {
    %0 = tpu.iota {dimensions = array<i32: 1>} : vector<1x256xi32>
    %c15_i32 = arith.constant 15 : i32
    %1 = vector.broadcast %c15_i32 : i32 to vector<1x256xi32>
    %2 = arith.andi %0, %1 : vector<1x256xi32>
    %c16_i32 = arith.constant 16 : i32
    %3 = vector.broadcast %c16_i32 : i32 to vector<1x256xi32>
    %4 = arith.cmpi sge, %0, %3 : vector<1x256xi32>
    %c1_i32 = arith.constant 1 : i32
    %5 = vector.broadcast %c1_i32 : i32 to vector<1x256xi32>
    %6 = arith.cmpi sge, %2, %5 : vector<1x256xi32>
    %7 = arith.andi %4, %6 : vector<1x256xi1>
    %8 = arith.extui %7 : vector<1x256xi1> to vector<1x256xi32>
    %9 = arith.sitofp %8 : vector<1x256xi32> to vector<1x256xf32>
    %c16_i32_0 = arith.constant 16 : i32
    %10 = vector.broadcast %c16_i32_0 : i32 to vector<1x256xi32>
    %11 = arith.cmpi sge, %0, %10 : vector<1x256xi32>
    %12 = arith.extui %11 : vector<1x256xi1> to vector<1x256xi32>
    %13 = arith.sitofp %12 : vector<1x256xi32> to vector<1x256xf32>
    %c16_i32_1 = arith.constant 16 : i32
    %14 = vector.broadcast %c16_i32_1 : i32 to vector<1x256xi32>
    %15 = arith.cmpi sge, %0, %14 : vector<1x256xi32>
    %c15_i32_2 = arith.constant 15 : i32
    %16 = vector.broadcast %c15_i32_2 : i32 to vector<1x256xi32>
    %17 = arith.cmpi slt, %2, %16 : vector<1x256xi32>
    %18 = arith.andi %15, %17 : vector<1x256xi1>
    %19 = arith.extui %18 : vector<1x256xi1> to vector<1x256xi32>
    %20 = arith.sitofp %19 : vector<1x256xi32> to vector<1x256xf32>
    %c1_i32_3 = arith.constant 1 : i32
    %21 = vector.broadcast %c1_i32_3 : i32 to vector<1x256xi32>
    %22 = arith.cmpi sge, %2, %21 : vector<1x256xi32>
    %23 = arith.extui %22 : vector<1x256xi1> to vector<1x256xi32>
    %24 = arith.sitofp %23 : vector<1x256xi32> to vector<1x256xf32>
    %c15_i32_4 = arith.constant 15 : i32
    %25 = vector.broadcast %c15_i32_4 : i32 to vector<1x256xi32>
    %26 = arith.cmpi slt, %2, %25 : vector<1x256xi32>
    %27 = arith.extui %26 : vector<1x256xi1> to vector<1x256xi32>
    %28 = arith.sitofp %27 : vector<1x256xi32> to vector<1x256xf32>
    %c240_i32 = arith.constant 240 : i32
    %29 = vector.broadcast %c240_i32 : i32 to vector<1x256xi32>
    %30 = arith.cmpi slt, %0, %29 : vector<1x256xi32>
    %c1_i32_5 = arith.constant 1 : i32
    %31 = vector.broadcast %c1_i32_5 : i32 to vector<1x256xi32>
    %32 = arith.cmpi sge, %2, %31 : vector<1x256xi32>
    %33 = arith.andi %30, %32 : vector<1x256xi1>
    %34 = arith.extui %33 : vector<1x256xi1> to vector<1x256xi32>
    %35 = arith.sitofp %34 : vector<1x256xi32> to vector<1x256xf32>
    %c240_i32_6 = arith.constant 240 : i32
    %36 = vector.broadcast %c240_i32_6 : i32 to vector<1x256xi32>
    %37 = arith.cmpi slt, %0, %36 : vector<1x256xi32>
    %38 = arith.extui %37 : vector<1x256xi1> to vector<1x256xi32>
    %39 = arith.sitofp %38 : vector<1x256xi32> to vector<1x256xf32>
    %c240_i32_7 = arith.constant 240 : i32
    %40 = vector.broadcast %c240_i32_7 : i32 to vector<1x256xi32>
    %41 = arith.cmpi slt, %0, %40 : vector<1x256xi32>
    %c15_i32_8 = arith.constant 15 : i32
    %42 = vector.broadcast %c15_i32_8 : i32 to vector<1x256xi32>
    %43 = arith.cmpi slt, %2, %42 : vector<1x256xi32>
    %44 = arith.andi %41, %43 : vector<1x256xi1>
    %45 = arith.extui %44 : vector<1x256xi1> to vector<1x256xi32>
    %46 = arith.sitofp %45 : vector<1x256xi32> to vector<1x256xf32>
    %c0 = arith.constant 0 : index
    %c0_9 = arith.constant 0 : index
    %c0_10 = arith.constant 0 : index
    %47 = vector.load %arg1[%c0, %c0_9, %c0_10] : memref<1x4x256xf32, #tpu.memory_space<vmem>>, vector<1x4x256xf32>
    %48 = vector.shape_cast %47 : vector<1x4x256xf32> to vector<4x256xf32>
    %cst = arith.constant 0.000000e+00 : f32
    %49 = vector.broadcast %cst : f32 to vector<4x256xf32>
    %c17_i32 = arith.constant 17 : i32
    %50 = tpu.dynamic_rotate %48 by %c17_i32 dim 1 : vector<4x256xf32>, i32 -> vector<4x256xf32>
    %51 = vector.broadcast %9 : vector<1x256xf32> to vector<4x256xf32>
    %52 = arith.mulf %50, %51 : vector<4x256xf32>
    %c0_11 = arith.constant 0 : index
    %c0_12 = arith.constant 0 : index
    %c0_13 = arith.constant 0 : index
    %53 = vector.load %arg2[%c0_11, %c0_12, %c0_13] : memref<9x4x4xf32, #tpu.memory_space<vmem>>, vector<1x4x4xf32>
    %54 = vector.shape_cast %53 : vector<1x4x4xf32> to vector<4x4xf32>
    %cst_14 = arith.constant dense<0.000000e+00> : vector<4x256xf32>
    %55 = tpu.matmul %54, %52, %cst_14 {dimension_numbers = #tpu.dot_dimension_numbers<[1], [0], [0], [1], [0, 0, 1, 1], [], []>} : vector<4x4xf32>, vector<4x256xf32>, vector<4x256xf32> -> vector<4x256xf32>
    %56 = arith.addf %49, %55 : vector<4x256xf32>
    %c16_i32_15 = arith.constant 16 : i32
    %57 = tpu.dynamic_rotate %48 by %c16_i32_15 dim 1 : vector<4x256xf32>, i32 -> vector<4x256xf32>
    %58 = vector.broadcast %13 : vector<1x256xf32> to vector<4x256xf32>
    %59 = arith.mulf %57, %58 : vector<4x256xf32>
    %c1 = arith.constant 1 : index
    %c0_16 = arith.constant 0 : index
    %c0_17 = arith.constant 0 : index
    %60 = vector.load %arg2[%c1, %c0_16, %c0_17] : memref<9x4x4xf32, #tpu.memory_space<vmem>>, vector<1x4x4xf32>
    %61 = vector.shape_cast %60 : vector<1x4x4xf32> to vector<4x4xf32>
    %cst_18 = arith.constant dense<0.000000e+00> : vector<4x256xf32>
    %62 = tpu.matmul %61, %59, %cst_18 {dimension_numbers = #tpu.dot_dimension_numbers<[1], [0], [0], [1], [0, 0, 1, 1], [], []>} : vector<4x4xf32>, vector<4x256xf32>, vector<4x256xf32> -> vector<4x256xf32>
    %63 = arith.addf %56, %62 : vector<4x256xf32>
    %c15_i32_19 = arith.constant 15 : i32
    %64 = tpu.dynamic_rotate %48 by %c15_i32_19 dim 1 : vector<4x256xf32>, i32 -> vector<4x256xf32>
    %65 = vector.broadcast %20 : vector<1x256xf32> to vector<4x256xf32>
    %66 = arith.mulf %64, %65 : vector<4x256xf32>
    %c2 = arith.constant 2 : index
    %c0_20 = arith.constant 0 : index
    %c0_21 = arith.constant 0 : index
    %67 = vector.load %arg2[%c2, %c0_20, %c0_21] : memref<9x4x4xf32, #tpu.memory_space<vmem>>, vector<1x4x4xf32>
    %68 = vector.shape_cast %67 : vector<1x4x4xf32> to vector<4x4xf32>
    %cst_22 = arith.constant dense<0.000000e+00> : vector<4x256xf32>
    %69 = tpu.matmul %68, %66, %cst_22 {dimension_numbers = #tpu.dot_dimension_numbers<[1], [0], [0], [1], [0, 0, 1, 1], [], []>} : vector<4x4xf32>, vector<4x256xf32>, vector<4x256xf32> -> vector<4x256xf32>
    %70 = arith.addf %63, %69 : vector<4x256xf32>
    %c1_i32_23 = arith.constant 1 : i32
    %71 = tpu.dynamic_rotate %48 by %c1_i32_23 dim 1 : vector<4x256xf32>, i32 -> vector<4x256xf32>
    %72 = vector.broadcast %24 : vector<1x256xf32> to vector<4x256xf32>
    %73 = arith.mulf %71, %72 : vector<4x256xf32>
    %c3 = arith.constant 3 : index
    %c0_24 = arith.constant 0 : index
    %c0_25 = arith.constant 0 : index
    %74 = vector.load %arg2[%c3, %c0_24, %c0_25] : memref<9x4x4xf32, #tpu.memory_space<vmem>>, vector<1x4x4xf32>
    %75 = vector.shape_cast %74 : vector<1x4x4xf32> to vector<4x4xf32>
    %cst_26 = arith.constant dense<0.000000e+00> : vector<4x256xf32>
    %76 = tpu.matmul %75, %73, %cst_26 {dimension_numbers = #tpu.dot_dimension_numbers<[1], [0], [0], [1], [0, 0, 1, 1], [], []>} : vector<4x4xf32>, vector<4x256xf32>, vector<4x256xf32> -> vector<4x256xf32>
    %77 = arith.addf %70, %76 : vector<4x256xf32>
    %c4 = arith.constant 4 : index
    %c0_27 = arith.constant 0 : index
    %c0_28 = arith.constant 0 : index
    %78 = vector.load %arg2[%c4, %c0_27, %c0_28] : memref<9x4x4xf32, #tpu.memory_space<vmem>>, vector<1x4x4xf32>
    %79 = vector.shape_cast %78 : vector<1x4x4xf32> to vector<4x4xf32>
    %cst_29 = arith.constant dense<0.000000e+00> : vector<4x256xf32>
    %80 = tpu.matmul %79, %48, %cst_29 {dimension_numbers = #tpu.dot_dimension_numbers<[1], [0], [0], [1], [0, 0, 1, 1], [], []>} : vector<4x4xf32>, vector<4x256xf32>, vector<4x256xf32> -> vector<4x256xf32>
    %81 = arith.addf %77, %80 : vector<4x256xf32>
    %c255_i32 = arith.constant 255 : i32
    %82 = tpu.dynamic_rotate %48 by %c255_i32 dim 1 : vector<4x256xf32>, i32 -> vector<4x256xf32>
    %83 = vector.broadcast %28 : vector<1x256xf32> to vector<4x256xf32>
    %84 = arith.mulf %82, %83 : vector<4x256xf32>
    %c5 = arith.constant 5 : index
    %c0_30 = arith.constant 0 : index
    %c0_31 = arith.constant 0 : index
    %85 = vector.load %arg2[%c5, %c0_30, %c0_31] : memref<9x4x4xf32, #tpu.memory_space<vmem>>, vector<1x4x4xf32>
    %86 = vector.shape_cast %85 : vector<1x4x4xf32> to vector<4x4xf32>
    %cst_32 = arith.constant dense<0.000000e+00> : vector<4x256xf32>
    %87 = tpu.matmul %86, %84, %cst_32 {dimension_numbers = #tpu.dot_dimension_numbers<[1], [0], [0], [1], [0, 0, 1, 1], [], []>} : vector<4x4xf32>, vector<4x256xf32>, vector<4x256xf32> -> vector<4x256xf32>
    %88 = arith.addf %81, %87 : vector<4x256xf32>
    %c241_i32 = arith.constant 241 : i32
    %89 = tpu.dynamic_rotate %48 by %c241_i32 dim 1 : vector<4x256xf32>, i32 -> vector<4x256xf32>
    %90 = vector.broadcast %35 : vector<1x256xf32> to vector<4x256xf32>
    %91 = arith.mulf %89, %90 : vector<4x256xf32>
    %c6 = arith.constant 6 : index
    %c0_33 = arith.constant 0 : index
    %c0_34 = arith.constant 0 : index
    %92 = vector.load %arg2[%c6, %c0_33, %c0_34] : memref<9x4x4xf32, #tpu.memory_space<vmem>>, vector<1x4x4xf32>
    %93 = vector.shape_cast %92 : vector<1x4x4xf32> to vector<4x4xf32>
    %cst_35 = arith.constant dense<0.000000e+00> : vector<4x256xf32>
    %94 = tpu.matmul %93, %91, %cst_35 {dimension_numbers = #tpu.dot_dimension_numbers<[1], [0], [0], [1], [0, 0, 1, 1], [], []>} : vector<4x4xf32>, vector<4x256xf32>, vector<4x256xf32> -> vector<4x256xf32>
    %95 = arith.addf %88, %94 : vector<4x256xf32>
    %c240_i32_36 = arith.constant 240 : i32
    %96 = tpu.dynamic_rotate %48 by %c240_i32_36 dim 1 : vector<4x256xf32>, i32 -> vector<4x256xf32>
    %97 = vector.broadcast %39 : vector<1x256xf32> to vector<4x256xf32>
    %98 = arith.mulf %96, %97 : vector<4x256xf32>
    %c7 = arith.constant 7 : index
    %c0_37 = arith.constant 0 : index
    %c0_38 = arith.constant 0 : index
    %99 = vector.load %arg2[%c7, %c0_37, %c0_38] : memref<9x4x4xf32, #tpu.memory_space<vmem>>, vector<1x4x4xf32>
    %100 = vector.shape_cast %99 : vector<1x4x4xf32> to vector<4x4xf32>
    %cst_39 = arith.constant dense<0.000000e+00> : vector<4x256xf32>
    %101 = tpu.matmul %100, %98, %cst_39 {dimension_numbers = #tpu.dot_dimension_numbers<[1], [0], [0], [1], [0, 0, 1, 1], [], []>} : vector<4x4xf32>, vector<4x256xf32>, vector<4x256xf32> -> vector<4x256xf32>
    %102 = arith.addf %95, %101 : vector<4x256xf32>
    %c239_i32 = arith.constant 239 : i32
    %103 = tpu.dynamic_rotate %48 by %c239_i32 dim 1 : vector<4x256xf32>, i32 -> vector<4x256xf32>
    %104 = vector.broadcast %46 : vector<1x256xf32> to vector<4x256xf32>
    %105 = arith.mulf %103, %104 : vector<4x256xf32>
    %c8 = arith.constant 8 : index
    %c0_40 = arith.constant 0 : index
    %c0_41 = arith.constant 0 : index
    %106 = vector.load %arg2[%c8, %c0_40, %c0_41] : memref<9x4x4xf32, #tpu.memory_space<vmem>>, vector<1x4x4xf32>
    %107 = vector.shape_cast %106 : vector<1x4x4xf32> to vector<4x4xf32>
    %cst_42 = arith.constant dense<0.000000e+00> : vector<4x256xf32>
    %108 = tpu.matmul %107, %105, %cst_42 {dimension_numbers = #tpu.dot_dimension_numbers<[1], [0], [0], [1], [0, 0, 1, 1], [], []>} : vector<4x4xf32>, vector<4x256xf32>, vector<4x256xf32> -> vector<4x256xf32>
    %109 = arith.addf %102, %108 : vector<4x256xf32>
    %c0_43 = arith.constant 0 : index
    %c0_44 = arith.constant 0 : index
    %110 = vector.load %arg3[%c0_43, %c0_44] : memref<4x1xf32, #tpu.memory_space<vmem>>, vector<4x1xf32>
    %111 = vector.broadcast %110 : vector<4x1xf32> to vector<4x256xf32>
    %112 = arith.addf %109, %111 : vector<4x256xf32>
    %cst_45 = arith.constant 0.000000e+00 : f32
    %113 = vector.broadcast %cst_45 : f32 to vector<4x256xf32>
    %114 = arith.maximumf %112, %113 : vector<4x256xf32>
    %cst_46 = arith.constant 0.000000e+00 : f32
    %115 = vector.broadcast %cst_46 : f32 to vector<4x256xf32>
    %c17_i32_47 = arith.constant 17 : i32
    %116 = tpu.dynamic_rotate %114 by %c17_i32_47 dim 1 : vector<4x256xf32>, i32 -> vector<4x256xf32>
    %117 = vector.broadcast %9 : vector<1x256xf32> to vector<4x256xf32>
    %118 = arith.mulf %116, %117 : vector<4x256xf32>
    %c0_48 = arith.constant 0 : index
    %c0_49 = arith.constant 0 : index
    %c0_50 = arith.constant 0 : index
    %119 = vector.load %arg4[%c0_48, %c0_49, %c0_50] : memref<9x4x4xf32, #tpu.memory_space<vmem>>, vector<1x4x4xf32>
    %120 = vector.shape_cast %119 : vector<1x4x4xf32> to vector<4x4xf32>
    %cst_51 = arith.constant dense<0.000000e+00> : vector<4x256xf32>
    %121 = tpu.matmul %120, %118, %cst_51 {dimension_numbers = #tpu.dot_dimension_numbers<[1], [0], [0], [1], [0, 0, 1, 1], [], []>} : vector<4x4xf32>, vector<4x256xf32>, vector<4x256xf32> -> vector<4x256xf32>
    %122 = arith.addf %115, %121 : vector<4x256xf32>
    %c16_i32_52 = arith.constant 16 : i32
    %123 = tpu.dynamic_rotate %114 by %c16_i32_52 dim 1 : vector<4x256xf32>, i32 -> vector<4x256xf32>
    %124 = vector.broadcast %13 : vector<1x256xf32> to vector<4x256xf32>
    %125 = arith.mulf %123, %124 : vector<4x256xf32>
    %c1_53 = arith.constant 1 : index
    %c0_54 = arith.constant 0 : index
    %c0_55 = arith.constant 0 : index
    %126 = vector.load %arg4[%c1_53, %c0_54, %c0_55] : memref<9x4x4xf32, #tpu.memory_space<vmem>>, vector<1x4x4xf32>
    %127 = vector.shape_cast %126 : vector<1x4x4xf32> to vector<4x4xf32>
    %cst_56 = arith.constant dense<0.000000e+00> : vector<4x256xf32>
    %128 = tpu.matmul %127, %125, %cst_56 {dimension_numbers = #tpu.dot_dimension_numbers<[1], [0], [0], [1], [0, 0, 1, 1], [], []>} : vector<4x4xf32>, vector<4x256xf32>, vector<4x256xf32> -> vector<4x256xf32>
    %129 = arith.addf %122, %128 : vector<4x256xf32>
    %c15_i32_57 = arith.constant 15 : i32
    %130 = tpu.dynamic_rotate %114 by %c15_i32_57 dim 1 : vector<4x256xf32>, i32 -> vector<4x256xf32>
    %131 = vector.broadcast %20 : vector<1x256xf32> to vector<4x256xf32>
    %132 = arith.mulf %130, %131 : vector<4x256xf32>
    %c2_58 = arith.constant 2 : index
    %c0_59 = arith.constant 0 : index
    %c0_60 = arith.constant 0 : index
    %133 = vector.load %arg4[%c2_58, %c0_59, %c0_60] : memref<9x4x4xf32, #tpu.memory_space<vmem>>, vector<1x4x4xf32>
    %134 = vector.shape_cast %133 : vector<1x4x4xf32> to vector<4x4xf32>
    %cst_61 = arith.constant dense<0.000000e+00> : vector<4x256xf32>
    %135 = tpu.matmul %134, %132, %cst_61 {dimension_numbers = #tpu.dot_dimension_numbers<[1], [0], [0], [1], [0, 0, 1, 1], [], []>} : vector<4x4xf32>, vector<4x256xf32>, vector<4x256xf32> -> vector<4x256xf32>
    %136 = arith.addf %129, %135 : vector<4x256xf32>
    %c1_i32_62 = arith.constant 1 : i32
    %137 = tpu.dynamic_rotate %114 by %c1_i32_62 dim 1 : vector<4x256xf32>, i32 -> vector<4x256xf32>
    %138 = vector.broadcast %24 : vector<1x256xf32> to vector<4x256xf32>
    %139 = arith.mulf %137, %138 : vector<4x256xf32>
    %c3_63 = arith.constant 3 : index
    %c0_64 = arith.constant 0 : index
    %c0_65 = arith.constant 0 : index
    %140 = vector.load %arg4[%c3_63, %c0_64, %c0_65] : memref<9x4x4xf32, #tpu.memory_space<vmem>>, vector<1x4x4xf32>
    %141 = vector.shape_cast %140 : vector<1x4x4xf32> to vector<4x4xf32>
    %cst_66 = arith.constant dense<0.000000e+00> : vector<4x256xf32>
    %142 = tpu.matmul %141, %139, %cst_66 {dimension_numbers = #tpu.dot_dimension_numbers<[1], [0], [0], [1], [0, 0, 1, 1], [], []>} : vector<4x4xf32>, vector<4x256xf32>, vector<4x256xf32> -> vector<4x256xf32>
    %143 = arith.addf %136, %142 : vector<4x256xf32>
    %c4_67 = arith.constant 4 : index
    %c0_68 = arith.constant 0 : index
    %c0_69 = arith.constant 0 : index
    %144 = vector.load %arg4[%c4_67, %c0_68, %c0_69] : memref<9x4x4xf32, #tpu.memory_space<vmem>>, vector<1x4x4xf32>
    %145 = vector.shape_cast %144 : vector<1x4x4xf32> to vector<4x4xf32>
    %cst_70 = arith.constant dense<0.000000e+00> : vector<4x256xf32>
    %146 = tpu.matmul %145, %114, %cst_70 {dimension_numbers = #tpu.dot_dimension_numbers<[1], [0], [0], [1], [0, 0, 1, 1], [], []>} : vector<4x4xf32>, vector<4x256xf32>, vector<4x256xf32> -> vector<4x256xf32>
    %147 = arith.addf %143, %146 : vector<4x256xf32>
    %c255_i32_71 = arith.constant 255 : i32
    %148 = tpu.dynamic_rotate %114 by %c255_i32_71 dim 1 : vector<4x256xf32>, i32 -> vector<4x256xf32>
    %149 = vector.broadcast %28 : vector<1x256xf32> to vector<4x256xf32>
    %150 = arith.mulf %148, %149 : vector<4x256xf32>
    %c5_72 = arith.constant 5 : index
    %c0_73 = arith.constant 0 : index
    %c0_74 = arith.constant 0 : index
    %151 = vector.load %arg4[%c5_72, %c0_73, %c0_74] : memref<9x4x4xf32, #tpu.memory_space<vmem>>, vector<1x4x4xf32>
    %152 = vector.shape_cast %151 : vector<1x4x4xf32> to vector<4x4xf32>
    %cst_75 = arith.constant dense<0.000000e+00> : vector<4x256xf32>
    %153 = tpu.matmul %152, %150, %cst_75 {dimension_numbers = #tpu.dot_dimension_numbers<[1], [0], [0], [1], [0, 0, 1, 1], [], []>} : vector<4x4xf32>, vector<4x256xf32>, vector<4x256xf32> -> vector<4x256xf32>
    %154 = arith.addf %147, %153 : vector<4x256xf32>
    %c241_i32_76 = arith.constant 241 : i32
    %155 = tpu.dynamic_rotate %114 by %c241_i32_76 dim 1 : vector<4x256xf32>, i32 -> vector<4x256xf32>
    %156 = vector.broadcast %35 : vector<1x256xf32> to vector<4x256xf32>
    %157 = arith.mulf %155, %156 : vector<4x256xf32>
    %c6_77 = arith.constant 6 : index
    %c0_78 = arith.constant 0 : index
    %c0_79 = arith.constant 0 : index
    %158 = vector.load %arg4[%c6_77, %c0_78, %c0_79] : memref<9x4x4xf32, #tpu.memory_space<vmem>>, vector<1x4x4xf32>
    %159 = vector.shape_cast %158 : vector<1x4x4xf32> to vector<4x4xf32>
    %cst_80 = arith.constant dense<0.000000e+00> : vector<4x256xf32>
    %160 = tpu.matmul %159, %157, %cst_80 {dimension_numbers = #tpu.dot_dimension_numbers<[1], [0], [0], [1], [0, 0, 1, 1], [], []>} : vector<4x4xf32>, vector<4x256xf32>, vector<4x256xf32> -> vector<4x256xf32>
    %161 = arith.addf %154, %160 : vector<4x256xf32>
    %c240_i32_81 = arith.constant 240 : i32
    %162 = tpu.dynamic_rotate %114 by %c240_i32_81 dim 1 : vector<4x256xf32>, i32 -> vector<4x256xf32>
    %163 = vector.broadcast %39 : vector<1x256xf32> to vector<4x256xf32>
    %164 = arith.mulf %162, %163 : vector<4x256xf32>
    %c7_82 = arith.constant 7 : index
    %c0_83 = arith.constant 0 : index
    %c0_84 = arith.constant 0 : index
    %165 = vector.load %arg4[%c7_82, %c0_83, %c0_84] : memref<9x4x4xf32, #tpu.memory_space<vmem>>, vector<1x4x4xf32>
    %166 = vector.shape_cast %165 : vector<1x4x4xf32> to vector<4x4xf32>
    %cst_85 = arith.constant dense<0.000000e+00> : vector<4x256xf32>
    %167 = tpu.matmul %166, %164, %cst_85 {dimension_numbers = #tpu.dot_dimension_numbers<[1], [0], [0], [1], [0, 0, 1, 1], [], []>} : vector<4x4xf32>, vector<4x256xf32>, vector<4x256xf32> -> vector<4x256xf32>
    %168 = arith.addf %161, %167 : vector<4x256xf32>
    %c239_i32_86 = arith.constant 239 : i32
    %169 = tpu.dynamic_rotate %114 by %c239_i32_86 dim 1 : vector<4x256xf32>, i32 -> vector<4x256xf32>
    %170 = vector.broadcast %46 : vector<1x256xf32> to vector<4x256xf32>
    %171 = arith.mulf %169, %170 : vector<4x256xf32>
    %c8_87 = arith.constant 8 : index
    %c0_88 = arith.constant 0 : index
    %c0_89 = arith.constant 0 : index
    %172 = vector.load %arg4[%c8_87, %c0_88, %c0_89] : memref<9x4x4xf32, #tpu.memory_space<vmem>>, vector<1x4x4xf32>
    %173 = vector.shape_cast %172 : vector<1x4x4xf32> to vector<4x4xf32>
    %cst_90 = arith.constant dense<0.000000e+00> : vector<4x256xf32>
    %174 = tpu.matmul %173, %171, %cst_90 {dimension_numbers = #tpu.dot_dimension_numbers<[1], [0], [0], [1], [0, 0, 1, 1], [], []>} : vector<4x4xf32>, vector<4x256xf32>, vector<4x256xf32> -> vector<4x256xf32>
    %175 = arith.addf %168, %174 : vector<4x256xf32>
    %c0_91 = arith.constant 0 : index
    %c0_92 = arith.constant 0 : index
    %176 = vector.load %arg5[%c0_91, %c0_92] : memref<4x1xf32, #tpu.memory_space<vmem>>, vector<4x1xf32>
    %177 = vector.broadcast %176 : vector<4x1xf32> to vector<4x256xf32>
    %178 = arith.addf %175, %177 : vector<4x256xf32>
    %179 = arith.addf %178, %48 : vector<4x256xf32>
    %cst_93 = arith.constant 0.707106769 : f32
    %180 = vector.broadcast %cst_93 : f32 to vector<4x256xf32>
    %181 = arith.mulf %179, %180 : vector<4x256xf32>
    %cst_94 = arith.constant 0.000000e+00 : f32
    %182 = vector.broadcast %cst_94 : f32 to vector<4x256xf32>
    %c17_i32_95 = arith.constant 17 : i32
    %183 = tpu.dynamic_rotate %181 by %c17_i32_95 dim 1 : vector<4x256xf32>, i32 -> vector<4x256xf32>
    %184 = vector.broadcast %9 : vector<1x256xf32> to vector<4x256xf32>
    %185 = arith.mulf %183, %184 : vector<4x256xf32>
    %c0_96 = arith.constant 0 : index
    %c0_97 = arith.constant 0 : index
    %c0_98 = arith.constant 0 : index
    %186 = vector.load %arg6[%c0_96, %c0_97, %c0_98] : memref<9x4x4xf32, #tpu.memory_space<vmem>>, vector<1x4x4xf32>
    %187 = vector.shape_cast %186 : vector<1x4x4xf32> to vector<4x4xf32>
    %cst_99 = arith.constant dense<0.000000e+00> : vector<4x256xf32>
    %188 = tpu.matmul %187, %185, %cst_99 {dimension_numbers = #tpu.dot_dimension_numbers<[1], [0], [0], [1], [0, 0, 1, 1], [], []>} : vector<4x4xf32>, vector<4x256xf32>, vector<4x256xf32> -> vector<4x256xf32>
    %189 = arith.addf %182, %188 : vector<4x256xf32>
    %c16_i32_100 = arith.constant 16 : i32
    %190 = tpu.dynamic_rotate %181 by %c16_i32_100 dim 1 : vector<4x256xf32>, i32 -> vector<4x256xf32>
    %191 = vector.broadcast %13 : vector<1x256xf32> to vector<4x256xf32>
    %192 = arith.mulf %190, %191 : vector<4x256xf32>
    %c1_101 = arith.constant 1 : index
    %c0_102 = arith.constant 0 : index
    %c0_103 = arith.constant 0 : index
    %193 = vector.load %arg6[%c1_101, %c0_102, %c0_103] : memref<9x4x4xf32, #tpu.memory_space<vmem>>, vector<1x4x4xf32>
    %194 = vector.shape_cast %193 : vector<1x4x4xf32> to vector<4x4xf32>
    %cst_104 = arith.constant dense<0.000000e+00> : vector<4x256xf32>
    %195 = tpu.matmul %194, %192, %cst_104 {dimension_numbers = #tpu.dot_dimension_numbers<[1], [0], [0], [1], [0, 0, 1, 1], [], []>} : vector<4x4xf32>, vector<4x256xf32>, vector<4x256xf32> -> vector<4x256xf32>
    %196 = arith.addf %189, %195 : vector<4x256xf32>
    %c15_i32_105 = arith.constant 15 : i32
    %197 = tpu.dynamic_rotate %181 by %c15_i32_105 dim 1 : vector<4x256xf32>, i32 -> vector<4x256xf32>
    %198 = vector.broadcast %20 : vector<1x256xf32> to vector<4x256xf32>
    %199 = arith.mulf %197, %198 : vector<4x256xf32>
    %c2_106 = arith.constant 2 : index
    %c0_107 = arith.constant 0 : index
    %c0_108 = arith.constant 0 : index
    %200 = vector.load %arg6[%c2_106, %c0_107, %c0_108] : memref<9x4x4xf32, #tpu.memory_space<vmem>>, vector<1x4x4xf32>
    %201 = vector.shape_cast %200 : vector<1x4x4xf32> to vector<4x4xf32>
    %cst_109 = arith.constant dense<0.000000e+00> : vector<4x256xf32>
    %202 = tpu.matmul %201, %199, %cst_109 {dimension_numbers = #tpu.dot_dimension_numbers<[1], [0], [0], [1], [0, 0, 1, 1], [], []>} : vector<4x4xf32>, vector<4x256xf32>, vector<4x256xf32> -> vector<4x256xf32>
    %203 = arith.addf %196, %202 : vector<4x256xf32>
    %c1_i32_110 = arith.constant 1 : i32
    %204 = tpu.dynamic_rotate %181 by %c1_i32_110 dim 1 : vector<4x256xf32>, i32 -> vector<4x256xf32>
    %205 = vector.broadcast %24 : vector<1x256xf32> to vector<4x256xf32>
    %206 = arith.mulf %204, %205 : vector<4x256xf32>
    %c3_111 = arith.constant 3 : index
    %c0_112 = arith.constant 0 : index
    %c0_113 = arith.constant 0 : index
    %207 = vector.load %arg6[%c3_111, %c0_112, %c0_113] : memref<9x4x4xf32, #tpu.memory_space<vmem>>, vector<1x4x4xf32>
    %208 = vector.shape_cast %207 : vector<1x4x4xf32> to vector<4x4xf32>
    %cst_114 = arith.constant dense<0.000000e+00> : vector<4x256xf32>
    %209 = tpu.matmul %208, %206, %cst_114 {dimension_numbers = #tpu.dot_dimension_numbers<[1], [0], [0], [1], [0, 0, 1, 1], [], []>} : vector<4x4xf32>, vector<4x256xf32>, vector<4x256xf32> -> vector<4x256xf32>
    %210 = arith.addf %203, %209 : vector<4x256xf32>
    %c4_115 = arith.constant 4 : index
    %c0_116 = arith.constant 0 : index
    %c0_117 = arith.constant 0 : index
    %211 = vector.load %arg6[%c4_115, %c0_116, %c0_117] : memref<9x4x4xf32, #tpu.memory_space<vmem>>, vector<1x4x4xf32>
    %212 = vector.shape_cast %211 : vector<1x4x4xf32> to vector<4x4xf32>
    %cst_118 = arith.constant dense<0.000000e+00> : vector<4x256xf32>
    %213 = tpu.matmul %212, %181, %cst_118 {dimension_numbers = #tpu.dot_dimension_numbers<[1], [0], [0], [1], [0, 0, 1, 1], [], []>} : vector<4x4xf32>, vector<4x256xf32>, vector<4x256xf32> -> vector<4x256xf32>
    %214 = arith.addf %210, %213 : vector<4x256xf32>
    %c255_i32_119 = arith.constant 255 : i32
    %215 = tpu.dynamic_rotate %181 by %c255_i32_119 dim 1 : vector<4x256xf32>, i32 -> vector<4x256xf32>
    %216 = vector.broadcast %28 : vector<1x256xf32> to vector<4x256xf32>
    %217 = arith.mulf %215, %216 : vector<4x256xf32>
    %c5_120 = arith.constant 5 : index
    %c0_121 = arith.constant 0 : index
    %c0_122 = arith.constant 0 : index
    %218 = vector.load %arg6[%c5_120, %c0_121, %c0_122] : memref<9x4x4xf32, #tpu.memory_space<vmem>>, vector<1x4x4xf32>
    %219 = vector.shape_cast %218 : vector<1x4x4xf32> to vector<4x4xf32>
    %cst_123 = arith.constant dense<0.000000e+00> : vector<4x256xf32>
    %220 = tpu.matmul %219, %217, %cst_123 {dimension_numbers = #tpu.dot_dimension_numbers<[1], [0], [0], [1], [0, 0, 1, 1], [], []>} : vector<4x4xf32>, vector<4x256xf32>, vector<4x256xf32> -> vector<4x256xf32>
    %221 = arith.addf %214, %220 : vector<4x256xf32>
    %c241_i32_124 = arith.constant 241 : i32
    %222 = tpu.dynamic_rotate %181 by %c241_i32_124 dim 1 : vector<4x256xf32>, i32 -> vector<4x256xf32>
    %223 = vector.broadcast %35 : vector<1x256xf32> to vector<4x256xf32>
    %224 = arith.mulf %222, %223 : vector<4x256xf32>
    %c6_125 = arith.constant 6 : index
    %c0_126 = arith.constant 0 : index
    %c0_127 = arith.constant 0 : index
    %225 = vector.load %arg6[%c6_125, %c0_126, %c0_127] : memref<9x4x4xf32, #tpu.memory_space<vmem>>, vector<1x4x4xf32>
    %226 = vector.shape_cast %225 : vector<1x4x4xf32> to vector<4x4xf32>
    %cst_128 = arith.constant dense<0.000000e+00> : vector<4x256xf32>
    %227 = tpu.matmul %226, %224, %cst_128 {dimension_numbers = #tpu.dot_dimension_numbers<[1], [0], [0], [1], [0, 0, 1, 1], [], []>} : vector<4x4xf32>, vector<4x256xf32>, vector<4x256xf32> -> vector<4x256xf32>
    %228 = arith.addf %221, %227 : vector<4x256xf32>
    %c240_i32_129 = arith.constant 240 : i32
    %229 = tpu.dynamic_rotate %181 by %c240_i32_129 dim 1 : vector<4x256xf32>, i32 -> vector<4x256xf32>
    %230 = vector.broadcast %39 : vector<1x256xf32> to vector<4x256xf32>
    %231 = arith.mulf %229, %230 : vector<4x256xf32>
    %c7_130 = arith.constant 7 : index
    %c0_131 = arith.constant 0 : index
    %c0_132 = arith.constant 0 : index
    %232 = vector.load %arg6[%c7_130, %c0_131, %c0_132] : memref<9x4x4xf32, #tpu.memory_space<vmem>>, vector<1x4x4xf32>
    %233 = vector.shape_cast %232 : vector<1x4x4xf32> to vector<4x4xf32>
    %cst_133 = arith.constant dense<0.000000e+00> : vector<4x256xf32>
    %234 = tpu.matmul %233, %231, %cst_133 {dimension_numbers = #tpu.dot_dimension_numbers<[1], [0], [0], [1], [0, 0, 1, 1], [], []>} : vector<4x4xf32>, vector<4x256xf32>, vector<4x256xf32> -> vector<4x256xf32>
    %235 = arith.addf %228, %234 : vector<4x256xf32>
    %c239_i32_134 = arith.constant 239 : i32
    %236 = tpu.dynamic_rotate %181 by %c239_i32_134 dim 1 : vector<4x256xf32>, i32 -> vector<4x256xf32>
    %237 = vector.broadcast %46 : vector<1x256xf32> to vector<4x256xf32>
    %238 = arith.mulf %236, %237 : vector<4x256xf32>
    %c8_135 = arith.constant 8 : index
    %c0_136 = arith.constant 0 : index
    %c0_137 = arith.constant 0 : index
    %239 = vector.load %arg6[%c8_135, %c0_136, %c0_137] : memref<9x4x4xf32, #tpu.memory_space<vmem>>, vector<1x4x4xf32>
    %240 = vector.shape_cast %239 : vector<1x4x4xf32> to vector<4x4xf32>
    %cst_138 = arith.constant dense<0.000000e+00> : vector<4x256xf32>
    %241 = tpu.matmul %240, %238, %cst_138 {dimension_numbers = #tpu.dot_dimension_numbers<[1], [0], [0], [1], [0, 0, 1, 1], [], []>} : vector<4x4xf32>, vector<4x256xf32>, vector<4x256xf32> -> vector<4x256xf32>
    %242 = arith.addf %235, %241 : vector<4x256xf32>
    %c0_139 = arith.constant 0 : index
    %c0_140 = arith.constant 0 : index
    %243 = vector.load %arg7[%c0_139, %c0_140] : memref<4x1xf32, #tpu.memory_space<vmem>>, vector<4x1xf32>
    %244 = vector.broadcast %243 : vector<4x1xf32> to vector<4x256xf32>
    %245 = arith.addf %242, %244 : vector<4x256xf32>
    %cst_141 = arith.constant 0.000000e+00 : f32
    %246 = vector.broadcast %cst_141 : f32 to vector<4x256xf32>
    %247 = arith.maximumf %245, %246 : vector<4x256xf32>
    %cst_142 = arith.constant 0.000000e+00 : f32
    %248 = vector.broadcast %cst_142 : f32 to vector<4x256xf32>
    %c17_i32_143 = arith.constant 17 : i32
    %249 = tpu.dynamic_rotate %247 by %c17_i32_143 dim 1 : vector<4x256xf32>, i32 -> vector<4x256xf32>
    %250 = vector.broadcast %9 : vector<1x256xf32> to vector<4x256xf32>
    %251 = arith.mulf %249, %250 : vector<4x256xf32>
    %c0_144 = arith.constant 0 : index
    %c0_145 = arith.constant 0 : index
    %c0_146 = arith.constant 0 : index
    %252 = vector.load %arg8[%c0_144, %c0_145, %c0_146] : memref<9x4x4xf32, #tpu.memory_space<vmem>>, vector<1x4x4xf32>
    %253 = vector.shape_cast %252 : vector<1x4x4xf32> to vector<4x4xf32>
    %cst_147 = arith.constant dense<0.000000e+00> : vector<4x256xf32>
    %254 = tpu.matmul %253, %251, %cst_147 {dimension_numbers = #tpu.dot_dimension_numbers<[1], [0], [0], [1], [0, 0, 1, 1], [], []>} : vector<4x4xf32>, vector<4x256xf32>, vector<4x256xf32> -> vector<4x256xf32>
    %255 = arith.addf %248, %254 : vector<4x256xf32>
    %c16_i32_148 = arith.constant 16 : i32
    %256 = tpu.dynamic_rotate %247 by %c16_i32_148 dim 1 : vector<4x256xf32>, i32 -> vector<4x256xf32>
    %257 = vector.broadcast %13 : vector<1x256xf32> to vector<4x256xf32>
    %258 = arith.mulf %256, %257 : vector<4x256xf32>
    %c1_149 = arith.constant 1 : index
    %c0_150 = arith.constant 0 : index
    %c0_151 = arith.constant 0 : index
    %259 = vector.load %arg8[%c1_149, %c0_150, %c0_151] : memref<9x4x4xf32, #tpu.memory_space<vmem>>, vector<1x4x4xf32>
    %260 = vector.shape_cast %259 : vector<1x4x4xf32> to vector<4x4xf32>
    %cst_152 = arith.constant dense<0.000000e+00> : vector<4x256xf32>
    %261 = tpu.matmul %260, %258, %cst_152 {dimension_numbers = #tpu.dot_dimension_numbers<[1], [0], [0], [1], [0, 0, 1, 1], [], []>} : vector<4x4xf32>, vector<4x256xf32>, vector<4x256xf32> -> vector<4x256xf32>
    %262 = arith.addf %255, %261 : vector<4x256xf32>
    %c15_i32_153 = arith.constant 15 : i32
    %263 = tpu.dynamic_rotate %247 by %c15_i32_153 dim 1 : vector<4x256xf32>, i32 -> vector<4x256xf32>
    %264 = vector.broadcast %20 : vector<1x256xf32> to vector<4x256xf32>
    %265 = arith.mulf %263, %264 : vector<4x256xf32>
    %c2_154 = arith.constant 2 : index
    %c0_155 = arith.constant 0 : index
    %c0_156 = arith.constant 0 : index
    %266 = vector.load %arg8[%c2_154, %c0_155, %c0_156] : memref<9x4x4xf32, #tpu.memory_space<vmem>>, vector<1x4x4xf32>
    %267 = vector.shape_cast %266 : vector<1x4x4xf32> to vector<4x4xf32>
    %cst_157 = arith.constant dense<0.000000e+00> : vector<4x256xf32>
    %268 = tpu.matmul %267, %265, %cst_157 {dimension_numbers = #tpu.dot_dimension_numbers<[1], [0], [0], [1], [0, 0, 1, 1], [], []>} : vector<4x4xf32>, vector<4x256xf32>, vector<4x256xf32> -> vector<4x256xf32>
    %269 = arith.addf %262, %268 : vector<4x256xf32>
    %c1_i32_158 = arith.constant 1 : i32
    %270 = tpu.dynamic_rotate %247 by %c1_i32_158 dim 1 : vector<4x256xf32>, i32 -> vector<4x256xf32>
    %271 = vector.broadcast %24 : vector<1x256xf32> to vector<4x256xf32>
    %272 = arith.mulf %270, %271 : vector<4x256xf32>
    %c3_159 = arith.constant 3 : index
    %c0_160 = arith.constant 0 : index
    %c0_161 = arith.constant 0 : index
    %273 = vector.load %arg8[%c3_159, %c0_160, %c0_161] : memref<9x4x4xf32, #tpu.memory_space<vmem>>, vector<1x4x4xf32>
    %274 = vector.shape_cast %273 : vector<1x4x4xf32> to vector<4x4xf32>
    %cst_162 = arith.constant dense<0.000000e+00> : vector<4x256xf32>
    %275 = tpu.matmul %274, %272, %cst_162 {dimension_numbers = #tpu.dot_dimension_numbers<[1], [0], [0], [1], [0, 0, 1, 1], [], []>} : vector<4x4xf32>, vector<4x256xf32>, vector<4x256xf32> -> vector<4x256xf32>
    %276 = arith.addf %269, %275 : vector<4x256xf32>
    %c4_163 = arith.constant 4 : index
    %c0_164 = arith.constant 0 : index
    %c0_165 = arith.constant 0 : index
    %277 = vector.load %arg8[%c4_163, %c0_164, %c0_165] : memref<9x4x4xf32, #tpu.memory_space<vmem>>, vector<1x4x4xf32>
    %278 = vector.shape_cast %277 : vector<1x4x4xf32> to vector<4x4xf32>
    %cst_166 = arith.constant dense<0.000000e+00> : vector<4x256xf32>
    %279 = tpu.matmul %278, %247, %cst_166 {dimension_numbers = #tpu.dot_dimension_numbers<[1], [0], [0], [1], [0, 0, 1, 1], [], []>} : vector<4x4xf32>, vector<4x256xf32>, vector<4x256xf32> -> vector<4x256xf32>
    %280 = arith.addf %276, %279 : vector<4x256xf32>
    %c255_i32_167 = arith.constant 255 : i32
    %281 = tpu.dynamic_rotate %247 by %c255_i32_167 dim 1 : vector<4x256xf32>, i32 -> vector<4x256xf32>
    %282 = vector.broadcast %28 : vector<1x256xf32> to vector<4x256xf32>
    %283 = arith.mulf %281, %282 : vector<4x256xf32>
    %c5_168 = arith.constant 5 : index
    %c0_169 = arith.constant 0 : index
    %c0_170 = arith.constant 0 : index
    %284 = vector.load %arg8[%c5_168, %c0_169, %c0_170] : memref<9x4x4xf32, #tpu.memory_space<vmem>>, vector<1x4x4xf32>
    %285 = vector.shape_cast %284 : vector<1x4x4xf32> to vector<4x4xf32>
    %cst_171 = arith.constant dense<0.000000e+00> : vector<4x256xf32>
    %286 = tpu.matmul %285, %283, %cst_171 {dimension_numbers = #tpu.dot_dimension_numbers<[1], [0], [0], [1], [0, 0, 1, 1], [], []>} : vector<4x4xf32>, vector<4x256xf32>, vector<4x256xf32> -> vector<4x256xf32>
    %287 = arith.addf %280, %286 : vector<4x256xf32>
    %c241_i32_172 = arith.constant 241 : i32
    %288 = tpu.dynamic_rotate %247 by %c241_i32_172 dim 1 : vector<4x256xf32>, i32 -> vector<4x256xf32>
    %289 = vector.broadcast %35 : vector<1x256xf32> to vector<4x256xf32>
    %290 = arith.mulf %288, %289 : vector<4x256xf32>
    %c6_173 = arith.constant 6 : index
    %c0_174 = arith.constant 0 : index
    %c0_175 = arith.constant 0 : index
    %291 = vector.load %arg8[%c6_173, %c0_174, %c0_175] : memref<9x4x4xf32, #tpu.memory_space<vmem>>, vector<1x4x4xf32>
    %292 = vector.shape_cast %291 : vector<1x4x4xf32> to vector<4x4xf32>
    %cst_176 = arith.constant dense<0.000000e+00> : vector<4x256xf32>
    %293 = tpu.matmul %292, %290, %cst_176 {dimension_numbers = #tpu.dot_dimension_numbers<[1], [0], [0], [1], [0, 0, 1, 1], [], []>} : vector<4x4xf32>, vector<4x256xf32>, vector<4x256xf32> -> vector<4x256xf32>
    %294 = arith.addf %287, %293 : vector<4x256xf32>
    %c240_i32_177 = arith.constant 240 : i32
    %295 = tpu.dynamic_rotate %247 by %c240_i32_177 dim 1 : vector<4x256xf32>, i32 -> vector<4x256xf32>
    %296 = vector.broadcast %39 : vector<1x256xf32> to vector<4x256xf32>
    %297 = arith.mulf %295, %296 : vector<4x256xf32>
    %c7_178 = arith.constant 7 : index
    %c0_179 = arith.constant 0 : index
    %c0_180 = arith.constant 0 : index
    %298 = vector.load %arg8[%c7_178, %c0_179, %c0_180] : memref<9x4x4xf32, #tpu.memory_space<vmem>>, vector<1x4x4xf32>
    %299 = vector.shape_cast %298 : vector<1x4x4xf32> to vector<4x4xf32>
    %cst_181 = arith.constant dense<0.000000e+00> : vector<4x256xf32>
    %300 = tpu.matmul %299, %297, %cst_181 {dimension_numbers = #tpu.dot_dimension_numbers<[1], [0], [0], [1], [0, 0, 1, 1], [], []>} : vector<4x4xf32>, vector<4x256xf32>, vector<4x256xf32> -> vector<4x256xf32>
    %301 = arith.addf %294, %300 : vector<4x256xf32>
    %c239_i32_182 = arith.constant 239 : i32
    %302 = tpu.dynamic_rotate %247 by %c239_i32_182 dim 1 : vector<4x256xf32>, i32 -> vector<4x256xf32>
    %303 = vector.broadcast %46 : vector<1x256xf32> to vector<4x256xf32>
    %304 = arith.mulf %302, %303 : vector<4x256xf32>
    %c8_183 = arith.constant 8 : index
    %c0_184 = arith.constant 0 : index
    %c0_185 = arith.constant 0 : index
    %305 = vector.load %arg8[%c8_183, %c0_184, %c0_185] : memref<9x4x4xf32, #tpu.memory_space<vmem>>, vector<1x4x4xf32>
    %306 = vector.shape_cast %305 : vector<1x4x4xf32> to vector<4x4xf32>
    %cst_186 = arith.constant dense<0.000000e+00> : vector<4x256xf32>
    %307 = tpu.matmul %306, %304, %cst_186 {dimension_numbers = #tpu.dot_dimension_numbers<[1], [0], [0], [1], [0, 0, 1, 1], [], []>} : vector<4x4xf32>, vector<4x256xf32>, vector<4x256xf32> -> vector<4x256xf32>
    %308 = arith.addf %301, %307 : vector<4x256xf32>
    %c0_187 = arith.constant 0 : index
    %c0_188 = arith.constant 0 : index
    %309 = vector.load %arg9[%c0_187, %c0_188] : memref<4x1xf32, #tpu.memory_space<vmem>>, vector<4x1xf32>
    %310 = vector.broadcast %309 : vector<4x1xf32> to vector<4x256xf32>
    %311 = arith.addf %308, %310 : vector<4x256xf32>
    %312 = arith.addf %311, %181 : vector<4x256xf32>
    %cst_189 = arith.constant 0.707106769 : f32
    %313 = vector.broadcast %cst_189 : f32 to vector<4x256xf32>
    %314 = arith.mulf %312, %313 : vector<4x256xf32>
    %c0_190 = arith.constant 0 : index
    %c0_191 = arith.constant 0 : index
    %c0_192 = arith.constant 0 : index
    %315 = vector.load %arg10[%c0_190, %c0_191, %c0_192] : memref<1x4x256xf32, #tpu.memory_space<vmem>>, vector<1x4x256xf32>
    %316 = vector.shape_cast %315 : vector<1x4x256xf32> to vector<4x256xf32>
    %317 = vector.shape_cast %314 : vector<4x256xf32> to vector<1x4x256xf32>
    tpu.vector_store %arg10[%c0_190, %c0_191, %c0_192], %317 {strides = array<i32>} : memref<1x4x256xf32, #tpu.memory_space<vmem>>, vector<1x4x256xf32>,
    return
  }
  func.func @transform_0(%arg0: i32) -> (i32, i32, i32) {
    %c0_i32 = arith.constant 0 : i32
    %c0_i32_0 = arith.constant 0 : i32
    %c0_i32_1 = arith.constant 0 : i32
    return %arg0, %c0_i32, %c0_i32_0 : i32, i32, i32
  }
  func.func @transform_1(%arg0: i32) -> (i32, i32, i32) {
    %c0_i32 = arith.constant 0 : i32
    %c0_i32_0 = arith.constant 0 : i32
    %c0_i32_1 = arith.constant 0 : i32
    %c0_i32_2 = arith.constant 0 : i32
    return %c0_i32, %c0_i32_0, %c0_i32_1 : i32, i32, i32
  }
  func.func @transform_2(%arg0: i32) -> (i32, i32) {
    %c0_i32 = arith.constant 0 : i32
    %c0_i32_0 = arith.constant 0 : i32
    %c0_i32_1 = arith.constant 0 : i32
    return %c0_i32, %c0_i32_0 : i32, i32
  }
  func.func @transform_3(%arg0: i32) -> (i32, i32, i32) {
    %c0_i32 = arith.constant 0 : i32
    %c0_i32_0 = arith.constant 0 : i32
    %c0_i32_1 = arith.constant 0 : i32
    %c0_i32_2 = arith.constant 0 : i32
    return %c0_i32, %c0_i32_0, %c0_i32_1 : i32, i32, i32
  }
  func.func @transform_4(%arg0: i32) -> (i32, i32) {
    %c0_i32 = arith.constant 0 : i32
    %c0_i32_0 = arith.constant 0 : i32
    %c0_i32_1 = arith.constant 0 : i32
    return %c0_i32, %c0_i32_0 : i32, i32
  }
  func.func @transform_5(%arg0: i32) -> (i32, i32, i32) {
    %c0_i32 = arith.constant 0 : i32
    %c0_i32_0 = arith.constant 0 : i32
    %c0_i32_1 = arith.constant 0 : i32
    %c0_i32_2 = arith.constant 0 : i32
    return %c0_i32, %c0_i32_0, %c0_i32_1 : i32, i32, i32
  }
  func.func @transform_6(%arg0: i32) -> (i32, i32) {
    %c0_i32 = arith.constant 0 : i32
    %c0_i32_0 = arith.constant 0 : i32
    %c0_i32_1 = arith.constant 0 : i32
    return %c0_i32, %c0_i32_0 : i32, i32
  }
  func.func @transform_7(%arg0: i32) -> (i32, i32, i32) {
    %c0_i32 = arith.constant 0 : i32
    %c0_i32_0 = arith.constant 0 : i32
    %c0_i32_1 = arith.constant 0 : i32
    %c0_i32_2 = arith.constant 0 : i32
    return %c0_i32, %c0_i32_0, %c0_i32_1 : i32, i32, i32
  }
  func.func @transform_8(%arg0: i32) -> (i32, i32) {
    %c0_i32 = arith.constant 0 : i32
    %c0_i32_0 = arith.constant 0 : i32
    %c0_i32_1 = arith.constant 0 : i32
    return %c0_i32, %c0_i32_0 : i32, i32
  }
  func.func @transform_9(%arg0: i32) -> (i32, i32, i32) {
    %c0_i32 = arith.constant 0 : i32
    %c0_i32_0 = arith.constant 0 : i32
    %c0_i32_1 = arith.constant 0 : i32
    return %arg0, %c0_i32, %c0_i32_0 : i32, i32, i32
  }
}

</mosaic_0001>

<bundles_post_ra>
// kernel: tpu_custom_call.1
= control target key start
LH: loop header
LB: loop body
LE: loop exit
PB: predicated region body
PF: predicated region fallthrough
CT: control target
= control target key end

     0   :  { %14 = vsyncpa [#allocation3], 0  ;;  %s4963_s0 = inlined_call_operand.vmem [shape: f32[2,4,256], index: 0, kind: input, shape index: {}]   ;;  %s4964_s1 = inlined_call_operand.vmem [shape: f32[9,4,4], index: 1, kind: input, shape index: {}]   ;;  %s4965_s2 = inlined_call_operand.vmem [shape: f32[4,1], index: 2, kind: input, shape index: {}]   ;;  %s4966_s3 = inlined_call_operand.vmem [shape: f32[9,4,4], index: 3, kind: input, shape index: {}]   ;;  %s4967_s4 = inlined_call_operand.vmem [shape: f32[4,1], index: 4, kind: input, shape index: {}]   ;;  %s4968_s5 = inlined_call_operand.vmem [shape: f32[9,4,4], index: 5, kind: input, shape index: {}]   ;;  %s4969_s6 = inlined_call_operand.vmem [shape: f32[4,1], index: 6, kind: input, shape index: {}]   ;;  %s4970_s7 = inlined_call_operand.vmem [shape: f32[9,4,4], index: 7, kind: input, shape index: {}]   ;;  %s4971_s8 = inlined_call_operand.vmem [shape: f32[4,1], index: 8, kind: input, shape index: {}]   ;;  %s4972_s9 = inlined_call_operand.hbm [shape: f32[2,4,256], index: 9, kind: output, shape index: {}]  }
   0x1   :  { %16 = vsyncpa [#allocation3 + $0x1], 0  ;;  %s4188_s30 = smov 0   ;;  %s4190_s10 = smov 0  }
   0x2   :  { %s4192_s11 = smov 0   ;;  %s4194_s12 = smov 0  }
   0x3 LB: > { %s4209_s13 = sadd.s32 4294967295, %s4125_s12   ;;  %s3779_s14 = sadd.s32 4294967294, %s4125_s12   ;;  %s4125_s12 = sphi %s4194_s12, %s4986_s12   ;;  %s4121_s11 = sphi %s4192_s11, %s4985_s11   ;;  %s4117_s10 = sphi %s4190_s10, %s4984_s10   ;;  %s4113_s30 = sphi %s4188_s30, %s4983_s30  }
   0x4   : > { %s4213_s15 = sadd.s32 1, %s4125_s12   ;;  %s223_s16 = sadd.s32 1, %s4121_s11 }
   0x5   : > { %s220_s17 = ssub.s32 %s4125_s12, %s4213_s15  ;;  %p233_p0 = scmp.ne.s32.totalorder %s4121_s11, %s4117_s10 }
   0x6   : > { %p221_p1 = scmp.eq.s32.totalorder %s220_s17, 0  ;;  %p234_p2 = scmp.eq.s32.totalorder %s4209_s13, 1 }
   0x7   : > { %p239_p3 = scmp.ne.s32.totalorder %s4117_s10, %s4113_s30  ;;  %p240_p4 = scmp.eq.s32.totalorder %s3779_s14, 1 }
   0x8   : > { %s4224_s18 = scalar_select %p221_p1, %s4121_s11, %s223_s16  }
   0x9   : > { %p4226_p5 = por %p234_p2, %p233_p0  ;;  %p4230_p6 = por %p240_p4, %p239_p3 }
   0xa   : > { %p3782_p7 = scmp.ge.s32.totalorder %s4125_s12, 1  ;;  %p290_p8 = scmp.lt.s32.totalorder %s4125_s12, 3 }
   0xc   : > { %p291_p9 = pnand %p3782_p7, %p290_p8 }
   0xd   : > { %p326_p10 = scmp.lt.s32.totalorder (!%p291_p9), %s4209_s13, 1  ;;  %v4127_v0 = vmov (!%p291_p9), 0.0   ;;  %s4128_s26 = smov (!%p291_p9), 17   ;;  %v1211_v3 = vld [vmem:[%s4965_s2] sm:$0xf] (!%p291_p9)  ;;  %v4136_v4 = vmov (!%p291_p9), 0   ;;  %v331_v5 = vlaneseq (!%p291_p9) }
   0xe   : > { %294 = sbr.rel (%p291_p9) target bundleno = 1653 (0x675), region = 56  ;;  %484 = vmatprep.mubr.f32.mxu0 (!%p291_p9), %v4127_v0  ;;  %1313 = vmatprep.mubr.f32.mxu1 (!%p291_p9), %v4127_v0  ;;  %s4129_s27 = smov (!%p291_p9), 16   ;;  %vm413_vm6 = vcmask (!%p291_p9), 1043456   ;;  %vm409_vm7 = vcmask (!%p291_p9), 31744   ;;  %v3800_v28 = vld [vmem:[%s4964_s1 + $0x4] sm:$0xf] (!%p291_p9) }
   0xf   : > { %s4130_s28 = smov (!%p291_p9), 15   ;;  %s4131_s29 = smov (!%p291_p9), 1   ;;  %4060 = vset.pattern.permute.xlu0 (!%p291_p9), %v4136_v4  ;;  %4061 = vset.pattern.permute.xlu1 (!%p291_p9), %v4136_v4  ;;  %v4284_v6 = vand.u32 (!%p291_p9), 127, %v331_v5  ;;  %v397_v40 = vld [vmem:[%s4964_s1] sm:$0xf] (!%p291_p9) }
  0x10   : > { %s4132_s14 = smov (!%p291_p9), 127   ;;  %s4133_s16 = smov (!%p291_p9), 113   ;;  %v3807_v45 = vld [vmem:[%s4964_s1 + $0x8] sm:$0xf] (!%p291_p9)  ;;  %v3811_v49 = vld [vmem:[%s4964_s1 + $0xc] sm:$0xf] (!%p291_p9) }
  0x11   : > { %s4134_s17 = smov (!%p291_p9), 112   ;;  %v4287_v7 = vadd.s32 (!%p291_p9), 128, %v4284_v6  ;;  %v334_v8 = vand.u32 (!%p291_p9), 15, %v4284_v6  ;;  %vm336_vm1 = vcmp.ge.s32.totalorder (!%p291_p9), %v4284_v6, 16  ;;  %vm392_vm4 = vcmp.lt.s32.totalorder (!%p291_p9), %v4284_v6, 17  ;;  %s3946_s24 = sshll.u32 (!%p291_p9), %s4209_s13, 7 }
  0x12   : > { %vm402_vm5 = vcmp.lt.s32.totalorder (!%p291_p9), %v4284_v6, 16  ;;  %v4317_v16 = vsel (!%p291_p9), %vm336_vm1, 1.0, %v4127_v0  ;;  %vm575_vm10 = vcmp.lt.s32.totalorder (!%p291_p9), %v4284_v6, 15  ;;  %vm668_vm12 = vcmp.lt.s32.totalorder (!%p291_p9), %v4284_v6, 1  ;;  %v3815_v58 = vld [vmem:[%s4964_s1 + $0x10] sm:$0xf] (!%p291_p9) }
  0x13   : > { %v335_v9 = vand.u32 (!%p291_p9), 15, %v4287_v7  ;;  %vm4291_vm0 = vcmp.ge.s32.totalorder (!%p291_p9), %v334_v8, 1  ;;  %vm4319_vm8 = vcmp.lt.s32.totalorder (!%p291_p9), %v334_v8, 15  ;;  %vm843_vm13 = vcmp.lt.s32.totalorder (!%p291_p9), %v4284_v6, 127  ;;  %v3819_v5 = vld [vmem:[%s4964_s1 + $0x14] sm:$0xf] (!%p291_p9) }
  0x14   : > { %vm340_vm3 = vmand (!%p291_p9), %vm336_vm1, %vm4291_vm0  ;;  %v4380_v42 = vsel (!%p291_p9), %vm4291_vm0, 1.0, %v4127_v0  ;;  %vm367_vm14 = vcmp.lt.s32.totalorder (!%p291_p9), %v4287_v7, 240  ;;  %vm936_vm0 = vcmp.lt.s32.totalorder (!%p291_p9), %v4284_v6, 113  ;;  %v4414_v53 = vsel (!%p291_p9), %vm4319_vm8, 1.0, %v4127_v0  ;;  %v3823_v7 = vld [vmem:[%s4964_s1 + $0x18] sm:$0xf] (!%p291_p9) }
  0x15   : > { %s327_s21 = scalar_select %p326_p10, %s4209_s13, 1  ;;  %vm4296_vm2 = vcmp.ge.s32.totalorder %v335_v9, 1  ;;  %v4307_v14 = vsel %vm340_vm3, 1.0, %v4127_v0  ;;  %vm4323_vm9 = vcmp.lt.s32.totalorder %v335_v9, 15  ;;  %vm352_vm11 = vmand %vm336_vm1, %vm4319_vm8  ;;  %vm1029_vm1 = vcmp.lt.s32.totalorder %v4284_v6, 112 }
  0x16   : > { %v4312_v15 = vsel %vm4296_vm2, 1.0, %v4127_v0  ;;  %v4346_v29 = vsel %vm4323_vm9, 1.0, %v4127_v0  ;;  %v4362_v34 = vsel %vm352_vm11, 1.0, %v4127_v0  ;;  %vm369_vm15 = vmand %vm367_vm14, %vm4296_vm2  ;;  %v4439_v63 = vsel %vm367_vm14, 1.0, %v4127_v0  ;;  %v3827_v20 = vld [vmem:[%s4964_s1 + $0x1c] sm:$0xf] }
  0x17   : > { %s3945_s22 = sshll.u32 %s327_s21, 3  ;;  %s4135_s21 = smov 111   ;;  %v4420_v55 = vsel %vm369_vm15, 1.0, %v4127_v0  ;;  %vm379_vm2 = vmand %vm367_vm14, %vm4323_vm9  ;;  %vm1122_vm3 = vcmp.lt.s32.totalorder %v4284_v6, 111 }
  0x18   : > { %s330_s25 = scalar_lea.vmem %s4963_s0, %s3945_s22  ;;  %s323_s22 = sand.u32 1, %s4117_s10  }
  0x19   : > { %v4243_v1 = vld [vmem:[%s330_s25] sm:$0xff]  ;;  %s3783_s23 = sshll.u32 %s323_s22, 3  ;;  %s4137_s13 = smov [#allocation2]  }
  0x1a   : > { %388 = vrot.lane.b32.xlu1 %v4243_v1, %s4128_s26  ;;  %398 = vrot.lane.b32.xlu0 %v4243_v1, %s4129_s27  ;;  %v4251_v2 = vcombine.high %v4243_v1, %v4243_v1  ;;  %s325_s25 = scalar_lea.vmem [#allocation2], %s3783_s23 }
  0x1e   : > { %390 = vrot.lane.b32.xlu1 %v4251_v2, %s4128_s26  ;;  %400 = vrot.lane.b32.xlu0 %v4251_v2, %s4129_s27 }
  0x22   : > { %573 = vrot.lane.b32.xlu1 %v4251_v2, %s4130_s28  ;;  %571 = vrot.lane.b32.xlu0 %v4243_v1, %s4130_s28 }
  0x26   : > { %666 = vrot.lane.b32.xlu1 %v4251_v2, %s4131_s29  ;;  %664 = vrot.lane.b32.xlu0 %v4243_v1, %s4131_s29 }
  0x2a   : > { %841 = vrot.lane.b32.xlu1 %v4251_v2, %s4132_s14  ;;  %839 = vrot.lane.b32.xlu0 %v4243_v1, %s4132_s14 }
  0x2e   : > { %934 = vrot.lane.b32.xlu1 %v4251_v2, %s4133_s16  ;;  %932 = vrot.lane.b32.xlu0 %v4243_v1, %s4133_s16 }
  0x32   : > { %1027 = vrot.lane.b32.xlu1 %v4251_v2, %s4134_s17  ;;  %1025 = vrot.lane.b32.xlu0 %v4243_v1, %s4134_s17 }
  0x36   : > { %1120 = vrot.lane.b32.xlu1 %v4251_v2, %s4135_s21  ;;  %1118 = vrot.lane.b32.xlu0 %v4243_v1, %s4135_s21 }
  0x3a   : > { %1214 = vperm.xlu0 %4060, %v1211_v3  }
  0x8c   : > { %v389_v11 = vpop.permute.xlu1 %388  ;;  %v399_v12 = vpop.permute.xlu0 %398 }
  0x90   : > { %v391_v17 = vpop.permute.xlu1 %390  ;;  %v401_v18 = vpop.permute.xlu0 %400 }
  0x91   : > { %v393_v21 = vsel %vm392_vm4, %v389_v11, %v391_v17  ;;  %v394_v22 = vsel %vm392_vm4, %v391_v17, %v389_v11  ;;  %v404_v23 = vsel %vm402_vm5, %v401_v18, %v399_v12  ;;  %v403_v24 = vsel %vm402_vm5, %v399_v12, %v401_v18 }
  0x92   : > { %v395_v25 = vmul.f32 %v4307_v14, %v394_v22  ;;  %v396_v26 = vmul.f32 %v4312_v15, %v393_v21  ;;  %v405_v27 = vmul.f32 %v4317_v16, %v404_v23  ;;  %3801 = vmatprep.subr.msk.mxu0 %vm413_vm6, %v403_v24  ;;  %v4458_v11 = vsel %vm379_vm2, 1.0, %v4127_v0  ;;  %v3831_v21 = vld [vmem:[%s4964_s1 + $0x20] sm:$0xf] }
  0x94   : > { %3802 = vmatpush1.msk.msra.mxu0 %vm413_vm6, %v405_v27  ;;  %v574_v30 = vpop.permute.xlu1 %573  ;;  %v572_v31 = vpop.permute.xlu0 %571 }
  0x95   : > { %3803 = vmatmul.mubr.msk.f32.vlgmr.msra.gmra.mrb[0].mxu0 %vm409_vm7, %v3800_v28  ;;  %3804 = vmatprep.subr.msk.mxu0 %vm413_vm6, %v396_v26  ;;  %v576_v32 = vsel %vm575_vm10, %v572_v31, %v574_v30  ;;  %v577_v35 = vsel %vm575_vm10, %v574_v30, %v572_v31  ;;  %v2036_v30 = vld [vmem:[%s4967_s4] sm:$0xf] }
  0x96   : > { %3805 = vmatpush1.msk.msra.mxu0 %vm413_vm6, %v395_v25  ;;  %v579_v33 = vmul.f32 %v4346_v29, %v576_v32  ;;  %564 = vmatprep.mubr.f32.mxu0 %v4127_v0  ;;  %v578_v39 = vmul.f32 %v4362_v34, %v577_v35 }
  0x98   : > { %3808 = vmatprep.subr.msk.mxu0 %vm413_vm6, %v579_v33  ;;  %v667_v36 = vpop.permute.xlu1 %666  ;;  %v665_v37 = vpop.permute.xlu0 %664 }
  0x99   : > { %v669_v38 = vsel %vm668_vm12, %v665_v37, %v667_v36  ;;  %v670_v43 = vsel %vm668_vm12, %v667_v36, %v665_v37 }
  0x9a   : > { %v672_v41 = vmul.f32 %v4312_v15, %v669_v38  ;;  %v671_v44 = vmul.f32 %v4380_v42, %v670_v43  ;;  %v3835_v38 = vld [vmem:[%s4966_s3 + $0x4] sm:$0xf] }
  0x9c   : > { %v842_v46 = vpop.permute.xlu1 %841  ;;  %v840_v47 = vpop.permute.xlu0 %839 }
  0x9d   : > { %3806 = vmatmul.mubr.msk.f32.vlgmr.msra.gmra.mrb[0].mxu0 %vm409_vm7, %v397_v40  ;;  %v845_v48 = vsel %vm843_vm13, %v842_v46, %v840_v47  ;;  %v844_v54 = vsel %vm843_vm13, %v840_v47, %v842_v46 }
  0x9e   : > { %3809 = vmatpush1.msk.msra.mxu0 %vm413_vm6, %v578_v39  ;;  %655 = vmatprep.mubr.f32.mxu0 %v4127_v0  ;;  %v847_v50 = vmul.f32 %v4346_v29, %v845_v48  ;;  %v846_v57 = vmul.f32 %v4414_v53, %v844_v54 }
  0x9f   : > { %3812 = vmatprep.subr.msk.mxu0 %vm413_vm6, %v672_v41 }
  0xa0   : > { %v935_v51 = vpop.permute.xlu1 %934  ;;  %v933_v52 = vpop.permute.xlu0 %932 }
  0xa1   : > { %v938_v56 = vsel %vm936_vm0, %v935_v51, %v933_v52  ;;  %v937_v62 = vsel %vm936_vm0, %v933_v52, %v935_v51  ;;  %v1229_v51 = vld [vmem:[%s4966_s3] sm:$0xf] }
  0xa2   : > { %v940_v59 = vmul.f32 %v4420_v55, %v938_v56  ;;  %v939_v4 = vmul.f32 %v4380_v42, %v937_v62 }
  0xa4   : > { %v1028_v60 = vpop.permute.xlu1 %1027  ;;  %v1026_v61 = vpop.permute.xlu0 %1025 }
  0xa5   : > { %3810 = vmatmul.mubr.msk.f32.vlgmr.msra.gmra.mrb[0].mxu0 %vm409_vm7, %v3807_v45  ;;  %v1031_v3 = vsel %vm1029_vm1, %v1028_v60, %v1026_v61  ;;  %v1030_v13 = vsel %vm1029_vm1, %v1026_v61, %v1028_v60 }
  0xa6   : > { %3813 = vmatpush1.msk.msra.mxu0 %vm413_vm6, %v671_v44  ;;  %748 = vmatprep.mubr.f32.mxu0 %v4127_v0  ;;  %v1033_v8 = vmul.f32 %v4439_v63, %v1031_v3 }
  0xa7   : > { %3816 = vmatprep.subr.msk.mxu0 %vm413_vm6, %v4251_v2 }
  0xa8   : > { %v1121_v9 = vpop.permute.xlu1 %1120  ;;  %v1119_v10 = vpop.permute.xlu0 %1118 }
  0xa9   : > { %v1124_v12 = vsel %vm1122_vm3, %v1121_v9, %v1119_v10  ;;  %v1123_v18 = vsel %vm1122_vm3, %v1119_v10, %v1121_v9 }
  0xaa   : > { %v1126_v17 = vmul.f32 %v4458_v11, %v1124_v12  ;;  %v1125_v19 = vmul.f32 %v4414_v53, %v1123_v18 }
  0xad   : > { %3814 = vmatmul.mubr.msk.f32.vlgmr.msra.gmra.mrb[0].mxu0 %vm409_vm7, %v3811_v49 }
  0xae   : > { %3817 = vmatpush1.msk.msra.mxu0 %vm413_vm6, %v4243_v1  ;;  %830 = vmatprep.mubr.f32.mxu0 %v4127_v0 }
  0xaf   : > { %3820 = vmatprep.subr.msk.mxu0 %vm413_vm6, %v847_v50 }
  0xb5   : > { %3818 = vmatmul.mubr.msk.f32.vlgmr.msra.gmra.mrb[0].mxu0 %vm409_vm7, %v3815_v58 }
  0xb6   : > { %3821 = vmatpush1.msk.msra.mxu0 %vm413_vm6, %v846_v57  ;;  %923 = vmatprep.mubr.f32.mxu0 %v4127_v0 }
  0xb7   : > { %3824 = vmatprep.subr.msk.mxu0 %vm413_vm6, %v940_v59  ;;  %v3842_v59 = vld [vmem:[%s4966_s3 + $0x8] sm:$0xf] }
  0xb9   : > { %v1215_v22 = vpop.permute.xlu0 %1214 }
  0xbd   : > { %3822 = vmatmul.mubr.msk.f32.vlgmr.msra.gmra.mrb[0].mxu0 %vm409_vm7, %v3819_v5 }
  0xbe   : > { %3825 = vmatpush1.msk.msra.mxu0 %vm413_vm6, %v939_v4  ;;  %1016 = vmatprep.mubr.f32.mxu0 %v4127_v0  ;;  %v3846_v4 = vld [vmem:[%s4966_s3 + $0xc] sm:$0xf] }
  0xbf   : > { %3828 = vmatprep.subr.msk.mxu0 %vm413_vm6, %v1033_v8 }
  0xc5   : > { %3826 = vmatmul.mubr.msk.f32.vlgmr.msra.gmra.mrb[0].mxu0 %vm409_vm7, %v3823_v7  ;;  %v3850_v7 = vld [vmem:[%s4966_s3 + $0x10] sm:$0xf] }
  0xc6   : > { %3829 = vmatpush1.msk.msra.mxu0 %vm413_vm6, %v1030_v13  ;;  %1109 = vmatprep.mubr.f32.mxu0 %v4127_v0 }
  0xc7   : > { %3832 = vmatprep.subr.msk.mxu0 %vm413_vm6, %v1126_v17 }
  0xcd   : > { %3830 = vmatmul.mubr.msk.f32.vlgmr.msra.gmra.mrb[0].mxu0 %vm409_vm7, %v3827_v20 }
  0xce   : > { %3833 = vmatpush1.msk.msra.mxu0 %vm413_vm6, %v1125_v19  ;;  %1202 = vmatprep.mubr.f32.mxu0 %v4127_v0 }
  0xd5   : > { %3834 = vmatmul.mubr.msk.f32.vlgmr.msra.gmra.mrb[0].mxu0 %vm409_vm7, %v3831_v21 }
  0xd6   : > { %2140 = vmatprep.mubr.f32.mxu0 %v4127_v0 }
 0x1a8   : > { %v1204_v23 = vpop.f32.mrb[0].mxu0 }
 0x1a9   : > { %v1217_v24 = vadd.f32 %v1215_v22, %v1204_v23  ;;  %v1206_v25 = vpop.f32.mrb[1].mxu0 }
 0x1aa   : > { %v1218_v27 = vadd.f32 %v1215_v22, %v1206_v25  ;;  %v3854_v22 = vld [vmem:[%s4966_s3 + $0x14] sm:$0xf] }
 0x1ab   : > { %v4486_v26 = vmax.f32 %v1217_v24, 0.0 }
 0x1ac   : > { %v1220_v28 = vmax.f32 %v1218_v27, 0.0 }
 0x1ad   : > { %1221 = vrot.lane.b32.xlu0 %v4486_v26, %s4128_s26  ;;  %1230 = vrot.lane.b32.xlu1 %v4486_v26, %s4129_s27 }
 0x1b1   : > { %1400 = vrot.lane.b32.xlu0 %v4486_v26, %s4130_s28  ;;  %1232 = vrot.lane.b32.xlu1 %v1220_v28, %s4129_s27 }
 0x1b5   : > { %1492 = vrot.lane.b32.xlu0 %v4486_v26, %s4131_s29  ;;  %1223 = vrot.lane.b32.xlu1 %v1220_v28, %s4128_s26 }
 0x1b9   : > { %1668 = vrot.lane.b32.xlu0 %v4486_v26, %s4132_s14  ;;  %1402 = vrot.lane.b32.xlu1 %v1220_v28, %s4130_s28 }
 0x1bd   : > { %1760 = vrot.lane.b32.xlu0 %v4486_v26, %s4133_s16  ;;  %1494 = vrot.lane.b32.xlu1 %v1220_v28, %s4131_s29 }
 0x1c1   : > { %1852 = vrot.lane.b32.xlu0 %v4486_v26, %s4134_s17  ;;  %1670 = vrot.lane.b32.xlu1 %v1220_v28, %s4132_s14 }
 0x1c5   : > { %1944 = vrot.lane.b32.xlu0 %v4486_v26, %s4135_s21  ;;  %1762 = vrot.lane.b32.xlu1 %v1220_v28, %s4133_s16 }
 0x1c9   : > { %2039 = vperm.xlu0 %4060, %v2036_v30   ;;  %1854 = vrot.lane.b32.xlu1 %v1220_v28, %s4134_s17 }
 0x1cd   : > { %1946 = vrot.lane.b32.xlu1 %v1220_v28, %s4135_s21 }
 0x21f   : > { %v1231_v31 = vpop.permute.xlu1 %1230  ;;  %v1222_v32 = vpop.permute.xlu0 %1221 }
 0x223   : > { %v1233_v33 = vpop.permute.xlu1 %1232  ;;  %v1401_v43 = vpop.permute.xlu0 %1400 }
 0x224   : > { %v1235_v35 = vsel %vm402_vm5, %v1233_v33, %v1231_v31  ;;  %v1234_v36 = vsel %vm402_vm5, %v1231_v31, %v1233_v33  ;;  %v3862_v33 = vld [vmem:[%s4966_s3 + $0x1c] sm:$0xf] }
 0x225   : > { %v1236_v37 = vmul.f32 %v4317_v16, %v1235_v35  ;;  %3836 = vmatprep.subr.msk.mxu1 %vm413_vm6, %v1234_v36  ;;  %v3866_v36 = vld [vmem:[%s4966_s3 + $0x20] sm:$0xf] }
 0x227   : > { %3837 = vmatpush1.msk.msra.mxu1 %vm413_vm6, %v1236_v37  ;;  %v1224_v39 = vpop.permute.xlu1 %1223  ;;  %v1493_v52 = vpop.permute.xlu0 %1492 }
 0x228   : > { %v1225_v40 = vsel %vm392_vm4, %v1222_v32, %v1224_v39  ;;  %v1226_v41 = vsel %vm392_vm4, %v1224_v39, %v1222_v32  ;;  %3838 = vmatmul.mubr.msk.f32.vlgmr.msra.gmra.mrb[0].mxu1 %vm409_vm7, %v3835_v38 }
 0x229   : > { %v1227_v44 = vmul.f32 %v4307_v14, %v1226_v41  ;;  %v1228_v45 = vmul.f32 %v4312_v15, %v1225_v40  ;;  %1393 = vmatprep.mubr.f32.mxu1 %v4127_v0 }
 0x22b   : > { %3839 = vmatprep.subr.msk.mxu1 %vm413_vm6, %v1228_v45  ;;  %v1403_v46 = vpop.permute.xlu1 %1402  ;;  %v1669_v62 = vpop.permute.xlu0 %1668 }
 0x22c   : > { %v1404_v47 = vsel %vm575_vm10, %v1401_v43, %v1403_v46  ;;  %v1405_v48 = vsel %vm575_vm10, %v1403_v46, %v1401_v43  ;;  %3840 = vmatpush1.msk.msra.mxu1 %vm413_vm6, %v1227_v44 }
 0x22d   : > { %v1406_v49 = vmul.f32 %v4362_v34, %v1405_v48  ;;  %v1407_v50 = vmul.f32 %v4346_v29, %v1404_v47 }
 0x22f   : > { %3843 = vmatprep.subr.msk.mxu1 %vm413_vm6, %v1407_v50  ;;  %v1495_v54 = vpop.permute.xlu1 %1494  ;;  %v1761_v9 = vpop.permute.xlu0 %1760 }
 0x230   : > { %v1496_v56 = vsel %vm668_vm12, %v1493_v52, %v1495_v54  ;;  %3841 = vmatmul.mubr.msk.f32.vlgmr.msra.gmra.mrb[0].mxu1 %vm409_vm7, %v1229_v51  ;;  %v1497_v58 = vsel %vm668_vm12, %v1495_v54, %v1493_v52  ;;  %v3870_v51 = vld [vmem:[%s4968_s5 + $0x4] sm:$0xf] }
 0x231   : > { %v1499_v57 = vmul.f32 %v4312_v15, %v1496_v56  ;;  %3844 = vmatpush1.msk.msra.mxu1 %vm413_vm6, %v1406_v49  ;;  %1483 = vmatprep.mubr.f32.mxu1 %v4127_v0  ;;  %v1498_v60 = vmul.f32 %v4380_v42, %v1497_v58 }
 0x233   : > { %3847 = vmatprep.subr.msk.mxu1 %vm413_vm6, %v1499_v57  ;;  %v1671_v61 = vpop.permute.xlu1 %1670  ;;  %v1853_v19 = vpop.permute.xlu0 %1852 }
 0x234   : > { %v1673_v3 = vsel %vm843_vm13, %v1671_v61, %v1669_v62  ;;  %v1672_v10 = vsel %vm843_vm13, %v1669_v62, %v1671_v61 }
 0x235   : > { %v1675_v5 = vmul.f32 %v4346_v29, %v1673_v3  ;;  %v1674_v13 = vmul.f32 %v4414_v53, %v1672_v10 }
 0x237   : > { %v1763_v8 = vpop.permute.xlu1 %1762 }
 0x238   : > { %3845 = vmatmul.mubr.msk.f32.vlgmr.msra.gmra.mrb[0].mxu1 %vm409_vm7, %v3842_v59  ;;  %v1765_v12 = vsel %vm936_vm0, %v1763_v8, %v1761_v9  ;;  %v1764_v20 = vsel %vm936_vm0, %v1761_v9, %v1763_v8  ;;  %v2056_v8 = vld [vmem:[%s4968_s5] sm:$0xf] }
 0x239   : > { %3848 = vmatpush1.msk.msra.mxu1 %vm413_vm6, %v1498_v60  ;;  %1575 = vmatprep.mubr.f32.mxu1 %v4127_v0  ;;  %v1767_v17 = vmul.f32 %v4420_v55, %v1765_v12  ;;  %v1766_v23 = vmul.f32 %v4380_v42, %v1764_v20 }
 0x23a   : > { %3851 = vmatprep.subr.msk.mxu1 %vm413_vm6, %v1220_v28  ;;  %v3858_v28 = vld [vmem:[%s4966_s3 + $0x18] sm:$0xf] }
 0x23b   : > { %v1855_v18 = vpop.permute.xlu1 %1854 }
 0x23c   : > { %v1857_v21 = vsel %vm1029_vm1, %v1855_v18, %v1853_v19  ;;  %v1856_v30 = vsel %vm1029_vm1, %v1853_v19, %v1855_v18 }
 0x23d   : > { %v1859_v24 = vmul.f32 %v4439_v63, %v1857_v21 }
 0x23f   : > { %v1947_v25 = vpop.permute.xlu1 %1946 }
 0x240   : > { %3849 = vmatmul.mubr.msk.f32.vlgmr.msra.gmra.mrb[0].mxu1 %vm409_vm7, %v3846_v4 }
 0x241   : > { %3852 = vmatpush1.msk.msra.mxu1 %vm413_vm6, %v4486_v26  ;;  %1659 = vmatprep.mubr.f32.mxu1 %v4127_v0  ;;  %v1945_v26 = vpop.permute.xlu0 %1944 }
 0x242   : > { %3855 = vmatprep.subr.msk.mxu1 %vm413_vm6, %v1675_v5  ;;  %v1949_v27 = vsel %vm1122_vm3, %v1947_v25, %v1945_v26  ;;  %v1948_v32 = vsel %vm1122_vm3, %v1945_v26, %v1947_v25 }
 0x243   : > { %v1951_v31 = vmul.f32 %v4458_v11, %v1949_v27  ;;  %v1950_v35 = vmul.f32 %v4414_v53, %v1948_v32 }
 0x248   : > { %3853 = vmatmul.mubr.msk.f32.vlgmr.msra.gmra.mrb[0].mxu1 %vm409_vm7, %v3850_v7  ;;  %v2040_v37 = vpop.permute.xlu0 %2039 }
 0x249   : > { %3856 = vmatpush1.msk.msra.mxu1 %vm413_vm6, %v1674_v13  ;;  %1751 = vmatprep.mubr.f32.mxu1 %v4127_v0 }
 0x24a   : > { %3859 = vmatprep.subr.msk.mxu1 %vm413_vm6, %v1767_v17  ;;  %v3877_v17 = vld [vmem:[%s4968_s5 + $0x8] sm:$0xf] }
 0x250   : > { %3857 = vmatmul.mubr.msk.f32.vlgmr.msra.gmra.mrb[0].mxu1 %vm409_vm7, %v3854_v22  ;;  %v3881_v22 = vld [vmem:[%s4968_s5 + $0xc] sm:$0xf] }
 0x251   : > { %3860 = vmatpush1.msk.msra.mxu1 %vm413_vm6, %v1766_v23  ;;  %1843 = vmatprep.mubr.f32.mxu1 %v4127_v0 }
 0x252   : > { %3863 = vmatprep.subr.msk.mxu1 %vm413_vm6, %v1859_v24 }
 0x258   : > { %3861 = vmatmul.mubr.msk.f32.vlgmr.msra.gmra.mrb[0].mxu1 %vm409_vm7, %v3858_v28  ;;  %v3885_v28 = vld [vmem:[%s4968_s5 + $0x10] sm:$0xf] }
 0x259   : > { %3864 = vmatpush1.msk.msra.mxu1 %vm413_vm6, %v1856_v30  ;;  %1935 = vmatprep.mubr.f32.mxu1 %v4127_v0 }
 0x25a   : > { %3867 = vmatprep.subr.msk.mxu1 %vm413_vm6, %v1951_v31 }
 0x260   : > { %3865 = vmatmul.mubr.msk.f32.vlgmr.msra.gmra.mrb[0].mxu1 %vm409_vm7, %v3862_v33 }
 0x261   : > { %3868 = vmatpush1.msk.msra.mxu1 %vm413_vm6, %v1950_v35  ;;  %2027 = vmatprep.mubr.f32.mxu1 %v4127_v0 }
 0x268   : > { %3869 = vmatmul.mubr.msk.f32.vlgmr.msra.gmra.mrb[0].mxu1 %vm409_vm7, %v3866_v36 }
 0x269   : > { %2965 = vmatprep.mubr.f32.mxu1 %v4127_v0 }
 0x33b   : > { %v2029_v38 = vpop.f32.mrb[0].mxu1 }
 0x33c   : > { %v2042_v39 = vadd.f32 %v2040_v37, %v2029_v38  ;;  %v2031_v40 = vpop.f32.mrb[1].mxu1 }
 0x33d   : > { %v2043_v41 = vadd.f32 %v2040_v37, %v2031_v40  ;;  %v3889_v37 = vld [vmem:[%s4968_s5 + $0x14] sm:$0xf] }
 0x33e   : > { %v2044_v43 = vadd.f32 %v2042_v39, %v4243_v1  ;;  %v2863_v1 = vld [vmem:[%s4969_s6] sm:$0xf] }
 0x33f   : > { %v2045_v44 = vadd.f32 %v2043_v41, %v4251_v2 }
 0x340   : > { %v4627_v45 = vmul.f32 0.70710677, %v2044_v43 }
 0x341   : > { %v4629_v46 = vmul.f32 0.70710677, %v2045_v44  ;;  %v3893_v44 = vld [vmem:[%s4968_s5 + $0x18] sm:$0xf] }
 0x342   : > { %2057 = vrot.lane.b32.xlu1 %v4627_v45, %s4129_s27 }
 0x343   : > { %2059 = vrot.lane.b32.xlu0 %v4629_v46, %s4129_s27 }
 0x346   : > { %2048 = vrot.lane.b32.xlu1 %v4627_v45, %s4128_s26 }
 0x347   : > { %2050 = vrot.lane.b32.xlu0 %v4629_v46, %s4128_s26 }
 0x34a   : > { %2227 = vrot.lane.b32.xlu1 %v4627_v45, %s4130_s28 }
 0x34b   : > { %2229 = vrot.lane.b32.xlu0 %v4629_v46, %s4130_s28 }
 0x34e   : > { %2319 = vrot.lane.b32.xlu1 %v4627_v45, %s4131_s29 }
 0x34f   : > { %2321 = vrot.lane.b32.xlu0 %v4629_v46, %s4131_s29 }
 0x352   : > { %2495 = vrot.lane.b32.xlu1 %v4627_v45, %s4132_s14 }
 0x353   : > { %2497 = vrot.lane.b32.xlu0 %v4629_v46, %s4132_s14 }
 0x356   : > { %2587 = vrot.lane.b32.xlu1 %v4627_v45, %s4133_s16 }
 0x357   : > { %2589 = vrot.lane.b32.xlu0 %v4629_v46, %s4133_s16 }
 0x35a   : > { %2679 = vrot.lane.b32.xlu1 %v4627_v45, %s4134_s17 }
 0x35b   : > { %2681 = vrot.lane.b32.xlu0 %v4629_v46, %s4134_s17 }
 0x35e   : > { %2771 = vrot.lane.b32.xlu1 %v4627_v45, %s4135_s21 }
 0x35f   : > { %2773 = vrot.lane.b32.xlu0 %v4629_v46, %s4135_s21 }
 0x362   : > { %2866 = vperm.xlu1 %4061, %v2863_v1  }
 0x3b4   : > { %v2058_v2 = vpop.permute.xlu1 %2057 }
 0x3b5   : > { %v2060_v47 = vpop.permute.xlu0 %2059 }
 0x3b6   : > { %v2061_v48 = vsel %vm402_vm5, %v2058_v2, %v2060_v47  ;;  %v2062_v49 = vsel %vm402_vm5, %v2060_v47, %v2058_v2 }
 0x3b7   : > { %v2063_v50 = vmul.f32 %v4317_v16, %v2062_v49  ;;  %3871 = vmatprep.subr.msk.mxu0 %vm413_vm6, %v2061_v48  ;;  %v3897_v48 = vld [vmem:[%s4968_s5 + $0x1c] sm:$0xf] }
 0x3b8   : > { %v2049_v52 = vpop.permute.xlu1 %2048 }
 0x3b9   : > { %3872 = vmatpush1.msk.msra.mxu0 %vm413_vm6, %v2063_v50  ;;  %v2051_v54 = vpop.permute.xlu0 %2050  ;;  %v3901_v50 = vld [vmem:[%s4968_s5 + $0x20] sm:$0xf] }
 0x3ba   : > { %v2052_v56 = vsel %vm392_vm4, %v2049_v52, %v2051_v54  ;;  %v2053_v57 = vsel %vm392_vm4, %v2051_v54, %v2049_v52  ;;  %3873 = vmatmul.mubr.msk.f32.vlgmr.msra.gmra.mrb[2].mxu0 %vm409_vm7, %v3870_v51 }
 0x3bb   : > { %v2054_v58 = vmul.f32 %v4307_v14, %v2053_v57  ;;  %v2055_v59 = vmul.f32 %v4312_v15, %v2052_v56  ;;  %2220 = vmatprep.mubr.f32.mxu0 %v4127_v0 }
 0x3bc   : > { %v2228_v60 = vpop.permute.xlu1 %2227 }
 0x3bd   : > { %3874 = vmatprep.subr.msk.mxu0 %vm413_vm6, %v2055_v59  ;;  %v2230_v61 = vpop.permute.xlu0 %2229 }
 0x3be   : > { %v2231_v62 = vsel %vm575_vm10, %v2228_v60, %v2230_v61  ;;  %v2232_v3 = vsel %vm575_vm10, %v2230_v61, %v2228_v60  ;;  %3875 = vmatpush1.msk.msra.mxu0 %vm413_vm6, %v2054_v58  ;;  %v3688_v60 = vld [vmem:[%s4971_s8] sm:$0xf] }
 0x3bf   : > { %v2233_v4 = vmul.f32 %v4362_v34, %v2232_v3  ;;  %v2234_v5 = vmul.f32 %v4346_v29, %v2231_v62 }
 0x3c0   : > { %v2320_v9 = vpop.permute.xlu1 %2319 }
 0x3c1   : > { %3878 = vmatprep.subr.msk.mxu0 %vm413_vm6, %v2234_v5  ;;  %v2322_v10 = vpop.permute.xlu0 %2321 }
 0x3c2   : > { %v2323_v12 = vsel %vm668_vm12, %v2320_v9, %v2322_v10  ;;  %3876 = vmatmul.mubr.msk.f32.vlgmr.msra.gmra.mrb[2].mxu0 %vm409_vm7, %v2056_v8  ;;  %v2324_v13 = vsel %vm668_vm12, %v2322_v10, %v2320_v9  ;;  %v3905_v8 = vld [vmem:[%s4970_s7 + $0x4] sm:$0xf] }
 0x3c3   : > { %v2326_v7 = vmul.f32 %v4312_v15, %v2323_v12  ;;  %3879 = vmatpush1.msk.msra.mxu0 %vm413_vm6, %v2233_v4  ;;  %2310 = vmatprep.mubr.f32.mxu0 %v4127_v0  ;;  %v2325_v18 = vmul.f32 %v4380_v42, %v2324_v13 }
 0x3c4   : > { %v2496_v19 = vpop.permute.xlu1 %2495 }
 0x3c5   : > { %3882 = vmatprep.subr.msk.mxu0 %vm413_vm6, %v2326_v7  ;;  %v2498_v20 = vpop.permute.xlu0 %2497 }
 0x3c6   : > { %v2500_v21 = vsel %vm843_vm13, %v2498_v20, %v2496_v19  ;;  %v2499_v26 = vsel %vm843_vm13, %v2496_v19, %v2498_v20 }
 0x3c7   : > { %v2502_v23 = vmul.f32 %v4346_v29, %v2500_v21  ;;  %v2501_v30 = vmul.f32 %v4414_v53, %v2499_v26 }
 0x3c8   : > { %v2588_v24 = vpop.permute.xlu1 %2587 }
 0x3c9   : > { %v2590_v25 = vpop.permute.xlu0 %2589 }
 0x3ca   : > { %3880 = vmatmul.mubr.msk.f32.vlgmr.msra.gmra.mrb[2].mxu0 %vm409_vm7, %v3877_v17  ;;  %v2592_v27 = vsel %vm936_vm0, %v2590_v25, %v2588_v24  ;;  %v2591_v35 = vsel %vm936_vm0, %v2588_v24, %v2590_v25 }
 0x3cb   : > { %3883 = vmatpush1.msk.msra.mxu0 %vm413_vm6, %v2325_v18  ;;  %2402 = vmatprep.mubr.f32.mxu0 %v4127_v0  ;;  %v2594_v31 = vmul.f32 %v4420_v55, %v2592_v27  ;;  %v2593_v38 = vmul.f32 %v4380_v42, %v2591_v35  ;;  %v3912_v27 = vld [vmem:[%s4970_s7 + $0x8] sm:$0xf] }
 0x3cc   : > { %3886 = vmatprep.subr.msk.mxu0 %vm413_vm6, %v4629_v46  ;;  %v2680_v32 = vpop.permute.xlu1 %2679 }
 0x3cd   : > { %v2682_v33 = vpop.permute.xlu0 %2681 }
 0x3ce   : > { %v2684_v36 = vsel %vm1029_vm1, %v2682_v33, %v2680_v32  ;;  %v2683_v1 = vsel %vm1029_vm1, %v2680_v32, %v2682_v33  ;;  %v3916_v32 = vld [vmem:[%s4970_s7 + $0xc] sm:$0xf] }
 0x3cf   : > { %v2686_v39 = vmul.f32 %v4439_v63, %v2684_v36 }
 0x3d0   : > { %v2772_v40 = vpop.permute.xlu1 %2771 }
 0x3d1   : > { %v2774_v41 = vpop.permute.xlu0 %2773 }
 0x3d2   : > { %3884 = vmatmul.mubr.msk.f32.vlgmr.msra.gmra.mrb[2].mxu0 %vm409_vm7, %v3881_v22  ;;  %v2776_v43 = vsel %vm1122_vm3, %v2774_v41, %v2772_v40  ;;  %v2775_v47 = vsel %vm1122_vm3, %v2772_v40, %v2774_v41  ;;  %v2881_v22 = vld [vmem:[%s4970_s7] sm:$0xf] }
 0x3d3   : > { %3887 = vmatpush1.msk.msra.mxu0 %vm413_vm6, %v4627_v45  ;;  %2486 = vmatprep.mubr.f32.mxu0 %v4127_v0  ;;  %v2778_v2 = vmul.f32 %v4458_v11, %v2776_v43  ;;  %v2777_v49 = vmul.f32 %v4414_v53, %v2775_v47 }
 0x3d4   : > { %3890 = vmatprep.subr.msk.mxu0 %vm413_vm6, %v2502_v23 }
 0x3da   : > { %3888 = vmatmul.mubr.msk.f32.vlgmr.msra.gmra.mrb[2].mxu0 %vm409_vm7, %v3885_v28 }
 0x3db   : > { %3891 = vmatpush1.msk.msra.mxu0 %vm413_vm6, %v2501_v30  ;;  %2578 = vmatprep.mubr.f32.mxu0 %v4127_v0 }
 0x3dc   : > { %3894 = vmatprep.subr.msk.mxu0 %vm413_vm6, %v2594_v31 }
 0x3e1   : > { %v2867_v51 = vpop.permute.xlu1 %2866 }
 0x3e2   : > { %3892 = vmatmul.mubr.msk.f32.vlgmr.msra.gmra.mrb[2].mxu0 %vm409_vm7, %v3889_v37 }
 0x3e3   : > { %3895 = vmatpush1.msk.msra.mxu0 %vm413_vm6, %v2593_v38  ;;  %2670 = vmatprep.mubr.f32.mxu0 %v4127_v0 }
 0x3e4   : > { %3898 = vmatprep.subr.msk.mxu0 %vm413_vm6, %v2686_v39 }
 0x3ea   : > { %3896 = vmatmul.mubr.msk.f32.vlgmr.msra.gmra.mrb[2].mxu0 %vm409_vm7, %v3893_v44 }
 0x3eb   : > { %3899 = vmatpush1.msk.msra.mxu0 %vm413_vm6, %v2683_v1  ;;  %2762 = vmatprep.mubr.f32.mxu0 %v4127_v0 }
 0x3ec   : > { %3902 = vmatprep.subr.msk.mxu0 %vm413_vm6, %v2778_v2 }
 0x3f2   : > { %3900 = vmatmul.mubr.msk.f32.vlgmr.msra.gmra.mrb[2].mxu0 %vm409_vm7, %v3897_v48 }
 0x3f3   : > { %3903 = vmatpush1.msk.msra.mxu0 %vm413_vm6, %v2777_v49  ;;  %2854 = vmatprep.mubr.f32.mxu0 %v4127_v0 }
 0x3fa   : > { %3904 = vmatmul.mubr.msk.f32.vlgmr.msra.gmra.mrb[2].mxu0 %vm409_vm7, %v3901_v50 }
 0x4cd   : > { %v2856_v52 = vpop.f32.mrb[2].mxu0 }
 0x4ce   : > { %v2869_v54 = vadd.f32 %v2867_v51, %v2856_v52  ;;  %v2858_v56 = vpop.f32.mrb[3].mxu0 }
 0x4cf   : > { %v2870_v57 = vadd.f32 %v2867_v51, %v2858_v56 }
 0x4d0   : > { %v4776_v58 = vmax.f32 %v2869_v54, 0.0  ;;  %v3932_v54 = vld [vmem:[%s4970_s7 + $0x1c] sm:$0xf] }
 0x4d1   : > { %v2872_v59 = vmax.f32 %v2870_v57, 0.0 }
 0x4d2   : > { %2882 = vrot.lane.b32.xlu0 %v4776_v58, %s4129_s27 }
 0x4d3   : > { %2884 = vrot.lane.b32.xlu1 %v2872_v59, %s4129_s27 }
 0x4d6   : > { %2873 = vrot.lane.b32.xlu0 %v4776_v58, %s4128_s26 }
 0x4d7   : > { %2875 = vrot.lane.b32.xlu1 %v2872_v59, %s4128_s26  ;;  %s3720_s26 = sshll.u32 %s325_s25, 4  ;;  %s4923_s26 = int_to_ptr.vmem [resolvable:$true] %s3720_s26 }
 0x4da   : > { %3052 = vrot.lane.b32.xlu0 %v4776_v58, %s4130_s28 }
 0x4db   : > { %3054 = vrot.lane.b32.xlu1 %v2872_v59, %s4130_s28 }
 0x4de   : > { %3144 = vrot.lane.b32.xlu0 %v4776_v58, %s4131_s29 }
 0x4df   : > { %3146 = vrot.lane.b32.xlu1 %v2872_v59, %s4131_s29  ;;  %s4921_s29 = scalar_lea.hbm %s4972_s9, %s3946_s24 }
 0x4e2   : > { %3320 = vrot.lane.b32.xlu0 %v4776_v58, %s4132_s14 }
 0x4e3   : > { %3322 = vrot.lane.b32.xlu1 %v2872_v59, %s4132_s14  ;;  %s3706_s14 = scalar_lea.sflag [#allocation3], %s323_s22 }
 0x4e6   : > { %3412 = vrot.lane.b32.xlu0 %v4776_v58, %s4133_s16 }
 0x4e7   : > { %3414 = vrot.lane.b32.xlu1 %v2872_v59, %s4133_s16  ;;  %s4063_s16 = scalar_lea.vmem %s4923_s26, 128 }
 0x4e8   : > { %p4064_p11 = scmp.ne.s32.totalorder %s4923_s26, %s4063_s16 }
 0x4ea   : > { %3504 = vrot.lane.b32.xlu0 %v4776_v58, %s4134_s17  ;;  %p4065_p12 = pnand %p4064_p11, %p4226_p5 }
 0x4eb   : > { %3506 = vrot.lane.b32.xlu1 %v2872_v59, %s4134_s17  ;;  %s4067_s17 = sshll.u32 %s4137_s13, 4  ;;  %s4068_s17 = int_to_ptr.vmem [resolvable:$false] %s4067_s17 }
 0x4ec   : > { %p4066_p13 = pneg %p4065_p12  ;;  %p4070_p0 = scmp.lt.s32.totalorder %s4923_s26, %s4068_s17 }
 0x4ee   : > { %3596 = vrot.lane.b32.xlu0 %v4776_v58, %s4135_s21 }
 0x4ef   : > { %3598 = vrot.lane.b32.xlu1 %v2872_v59, %s4135_s21  ;;  %s4069_s21 = scalar_lea.vmem %s4068_s17, 256 }
 0x4f0   : > { %p4071_p1 = scmp.lt.s32.totalorder %s4069_s21, %s4063_s16 }
 0x4f2   : > { %3691 = vperm.xlu0 %4060, %v3688_v60   ;;  %p4072_p2 = por %p4071_p1, %p4070_p0 }
 0x4f4   : > { %p4073_p3 = pnand %p4072_p2, %p4066_p13 }
 0x544   : > { %v2883_v61 = vpop.permute.xlu0 %2882 }
 0x545   : > { %v2885_v62 = vpop.permute.xlu1 %2884 }
 0x546   : > { %v2886_v3 = vsel %vm402_vm5, %v2883_v61, %v2885_v62  ;;  %v2887_v4 = vsel %vm402_vm5, %v2885_v62, %v2883_v61 }
 0x547   : > { %v2888_v5 = vmul.f32 %v4317_v16, %v2887_v4  ;;  %3906 = vmatprep.subr.msk.mxu1 %vm413_vm6, %v2886_v3 }
 0x548   : > { %v2874_v9 = vpop.permute.xlu0 %2873 }
 0x549   : > { %3907 = vmatpush1.msk.msra.mxu1 %vm413_vm6, %v2888_v5  ;;  %v2876_v10 = vpop.permute.xlu1 %2875 }
 0x54a   : > { %v2877_v12 = vsel %vm392_vm4, %v2874_v9, %v2876_v10  ;;  %v2878_v7 = vsel %vm392_vm4, %v2876_v10, %v2874_v9  ;;  %3908 = vmatmul.mubr.msk.f32.vlgmr.msra.gmra.mrb[2].mxu1 %vm409_vm7, %v3905_v8 }
 0x54b   : > { %v2879_v16 = vmul.f32 %v4307_v14, %v2878_v7  ;;  %v2880_v13 = vmul.f32 %v4312_v15, %v2877_v12  ;;  %3045 = vmatprep.mubr.f32.mxu1 %v4127_v0 }
 0x54c   : > { %v3053_v17 = vpop.permute.xlu0 %3052 }
 0x54d   : > { %3909 = vmatprep.subr.msk.mxu1 %vm413_vm6, %v2880_v13  ;;  %v3055_v18 = vpop.permute.xlu1 %3054 }
 0x54e   : > { %v3056_v19 = vsel %vm575_vm10, %v3053_v17, %v3055_v18  ;;  %v3057_v20 = vsel %vm575_vm10, %v3055_v18, %v3053_v17  ;;  %3910 = vmatpush1.msk.msra.mxu1 %vm413_vm6, %v2879_v16 }
 0x54f   : > { %v3058_v21 = vmul.f32 %v4362_v34, %v3057_v20  ;;  %v3059_v14 = vmul.f32 %v4346_v29, %v3056_v19 }
 0x550   : > { %v3145_v23 = vpop.permute.xlu0 %3144 }
 0x551   : > { %3913 = vmatprep.subr.msk.mxu1 %vm413_vm6, %v3059_v14  ;;  %v3147_v24 = vpop.permute.xlu1 %3146 }
 0x552   : > { %v3148_v25 = vsel %vm668_vm12, %v3145_v23, %v3147_v24  ;;  %3911 = vmatmul.mubr.msk.f32.vlgmr.msra.gmra.mrb[2].mxu1 %vm409_vm7, %v2881_v22  ;;  %v3149_v34 = vsel %vm668_vm12, %v3147_v24, %v3145_v23 }
 0x553   : > { %v3151_v26 = vmul.f32 %v4312_v15, %v3148_v25  ;;  %3914 = vmatpush1.msk.msra.mxu1 %vm413_vm6, %v3058_v21  ;;  %3135 = vmatprep.mubr.f32.mxu1 %v4127_v0  ;;  %v3150_v28 = vmul.f32 %v4380_v42, %v3149_v34 }
 0x554   : > { %v3321_v15 = vpop.permute.xlu0 %3320 }
 0x555   : > { %3917 = vmatprep.subr.msk.mxu1 %vm413_vm6, %v3151_v26  ;;  %v3323_v30 = vpop.permute.xlu1 %3322 }
 0x556   : > { %v3325_v31 = vsel %vm843_vm13, %v3323_v30, %v3321_v15  ;;  %v3324_v37 = vsel %vm843_vm13, %v3321_v15, %v3323_v30 }
 0x557   : > { %v3327_v33 = vmul.f32 %v4346_v29, %v3325_v31  ;;  %v3920_v29 = vld [vmem:[%s4970_s7 + $0x10] sm:$0xf]  ;;  %v3326_v39 = vmul.f32 %v4414_v53, %v3324_v37 }
 0x558   : > { %v3413_v35 = vpop.permute.xlu0 %3412 }
 0x559   : > { %v3415_v36 = vpop.permute.xlu1 %3414 }
 0x55a   : > { %3915 = vmatmul.mubr.msk.f32.vlgmr.msra.gmra.mrb[2].mxu1 %vm409_vm7, %v3912_v27  ;;  %v3417_v38 = vsel %vm936_vm0, %v3415_v36, %v3413_v35  ;;  %v3416_v44 = vsel %vm936_vm0, %v3413_v35, %v3415_v36 }
 0x55b   : > { %3918 = vmatpush1.msk.msra.mxu1 %vm413_vm6, %v3150_v28  ;;  %3227 = vmatprep.mubr.f32.mxu1 %v4127_v0  ;;  %v3419_v40 = vmul.f32 %v4420_v55, %v3417_v38  ;;  %v3924_v55 = vld [vmem:[%s4970_s7 + $0x14] sm:$0xf]  ;;  %v3418_v2 = vmul.f32 %v4380_v42, %v3416_v44  ;;  %v3928_v42 = vld [vmem:[%s4970_s7 + $0x18] sm:$0xf] }
 0x55c   : > { %3921 = vmatprep.subr.msk.mxu1 %vm413_vm6, %v2872_v59  ;;  %v3505_v41 = vpop.permute.xlu0 %3504 }
 0x55d   : > { %v3507_v43 = vpop.permute.xlu1 %3506 }
 0x55e   : > { %v3509_v1 = vsel %vm1029_vm1, %v3507_v43, %v3505_v41 }
 0x55f   : > { %v3511_v47 = vmul.f32 %v4439_v63, %v3509_v1  ;;  %v3508_v63 = vsel %vm1029_vm1, %v3505_v41, %v3507_v43 }
 0x560   : > { %v3597_v48 = vpop.permute.xlu0 %3596 }
 0x561   : > { %v3599_v49 = vpop.permute.xlu1 %3598 }
 0x562   : > { %3919 = vmatmul.mubr.msk.f32.vlgmr.msra.gmra.mrb[2].mxu1 %vm409_vm7, %v3916_v32  ;;  %v3601_v50 = vsel %vm1122_vm3, %v3599_v49, %v3597_v48  ;;  %v3600_v52 = vsel %vm1122_vm3, %v3597_v48, %v3599_v49 }
 0x563   : > { %3922 = vmatpush1.msk.msra.mxu1 %vm413_vm6, %v4776_v58  ;;  %3311 = vmatprep.mubr.f32.mxu1 %v4127_v0  ;;  %v3603_v51 = vmul.f32 %v4458_v11, %v3601_v50  ;;  %v3602_v56 = vmul.f32 %v4414_v53, %v3600_v52  ;;  %v3936_v11 = vld [vmem:[%s4970_s7 + $0x20] sm:$0xf] }
 0x564   : > { %3925 = vmatprep.subr.msk.mxu1 %vm413_vm6, %v3327_v33 }
 0x56a   : > { %3923 = vmatmul.mubr.msk.f32.vlgmr.msra.gmra.mrb[2].mxu1 %vm409_vm7, %v3920_v29 }
 0x56b   : > { %3926 = vmatpush1.msk.msra.mxu1 %vm413_vm6, %v3326_v39  ;;  %3403 = vmatprep.mubr.f32.mxu1 %v4127_v0 }
 0x56c   : > { %3929 = vmatprep.subr.msk.mxu1 %vm413_vm6, %v3419_v40 }
 0x571   : > { %v3692_v6 = vpop.permute.xlu0 %3691 }
 0x572   : > { %3927 = vmatmul.mubr.msk.f32.vlgmr.msra.gmra.mrb[2].mxu1 %vm409_vm7, %v3924_v55 }
 0x573   : > { %3930 = vmatpush1.msk.msra.mxu1 %vm413_vm6, %v3418_v2  ;;  %3495 = vmatprep.mubr.f32.mxu1 %v4127_v0 }
 0x574   : > { %3933 = vmatprep.subr.msk.mxu1 %vm413_vm6, %v3511_v47 }
 0x57a   : > { %3931 = vmatmul.mubr.msk.f32.vlgmr.msra.gmra.mrb[2].mxu1 %vm409_vm7, %v3928_v42 }
 0x57b   : > { %3934 = vmatpush1.msk.msra.mxu1 %vm413_vm6, %v3508_v63  ;;  %3587 = vmatprep.mubr.f32.mxu1 %v4127_v0 }
 0x57c   : > { %3937 = vmatprep.subr.msk.mxu1 %vm413_vm6, %v3603_v51 }
 0x582   : > { %3935 = vmatmul.mubr.msk.f32.vlgmr.msra.gmra.mrb[2].mxu1 %vm409_vm7, %v3932_v54 }
 0x583   : > { %3938 = vmatpush1.msk.msra.mxu1 %vm413_vm6, %v3602_v56  ;;  %3679 = vmatprep.mubr.f32.mxu1 %v4127_v0 }
 0x58a   : > { %3939 = vmatmul.mubr.msk.f32.vlgmr.msra.gmra.mrb[2].mxu1 %vm409_vm7, %v3936_v11 }
 0x65d   : > { %v3681_v57 = vpop.f32.mrb[2].mxu1 }
 0x65e   : > { %v3694_v58 = vadd.f32 %v3692_v6, %v3681_v57  ;;  %v3683_v59 = vpop.f32.mrb[3].mxu1 }
 0x65f   : > { %v3695_v53 = vadd.f32 %v3692_v6, %v3683_v59 }
 0x660   : > { %v3696_v60 = vadd.f32 %v3694_v58, %v4627_v45 }
 0x661   : > { %v3697_v61 = vadd.f32 %v3695_v53, %v4629_v46 }
 0x662   : > { %v3698_v62 = vmul.f32 0.70710677, %v3696_v60 }
 0x663   : > { %v3699_v0 = vmul.f32 0.70710677, %v3697_v61 }
 0x665   : > { %v3702_v3 = vcombine.low %v3698_v62, %v3699_v0 }
 0x667   : > { %3704 = vst [vmem:[%s325_s25] sm:$0xff] %v3702_v3 }
 0x668   : > { %4076 = shalt.err (!%p4073_p3)
}
 0x669   : > { %s4077_s22 = scalar_lea.hbm %s4921_s29, 128  ;;  %s4081_s25 = scalar_lea.hbm %s4972_s9, 256 }
 0x66a   : > { %p4078_p4 = scmp.ne.s32.totalorder %s4921_s29, %s4077_s22  ;;  %p4082_p9 = scmp.lt.u32.totalorder %s4921_s29, %s4972_s9 }
 0x66b   : > { %p4083_p10 = scmp.lt.u32.totalorder %s4081_s25, %s4077_s22  ;;  %p4085_p12 = scmp.lt.u32.totalorder %s4077_s22, %s4921_s29 }
 0x66c   : > { %p4079_p7 = pnand %p4078_p4, %p4226_p5 }
 0x66d   : > { %p4084_p11 = por %p4083_p10, %p4082_p9 }
 0x66e   : > { %p4080_p8 = pneg %p4079_p7 }
 0x66f   : > { %p4086_p13 = por %p4085_p12, %p4084_p11 }
 0x671   : > { %p4087_p0 = pnand %p4086_p13, %p4080_p8 }
 0x673   : > { %4090 = shalt.err (!%p4087_p0)
}
 0x674   : > { %4011 = dma.vmem_to_hbm [thread:$0]  (%p4226_p5), %s4923_s26, 128, %s4921_s29, %s3706_s14  }
 0x675 PF: > { %p4017_p1 = scmp.ge.s32.totalorder %s4125_s12, 2  ;;  %s3732_s16 = sand.u32 1, %s4113_s30  }
 0x676   : > { %s3733_s13 = scalar_lea.sflag [#allocation3], %s3732_s16 }
 0x677   : > { %p4014_p2 = pnand %p4017_p1, %p4230_p6 }
 0x679   : > { %4108 = dma.done.wait (!%p4014_p2), %s3733_s13, 128  }
 0x67a   : > { %4110 = vsyncadd (!%p4014_p2), %s3733_s13, 4294967168  ;;  %p19_p3 = scmp.ge.s32.totalorder %s4213_s15, 4   ;;  %s4983_s30 = smov %s4117_s10 }
 0x67b   : > { %s4984_s10 = smov %s4121_s11  ;;  %s4985_s11 = smov %s4224_s18 }
 0x67c   : > { %s4986_s12 = smov %s4213_s15  ;;  %21 = sbr.rel (!%p19_p3) target bundleno = 3 (0x3), region = 123 }
 0x683   :  { %3738 = vsyncpa [#allocation3], 1 }
 0x684   :  { %3740 = vsyncpa [#allocation3 + $0x1], 1 }

</bundles_post_ra>
